<compile_context>
chip_gen: v6e
topology: v6e:2x2x1
jax: 0.10.0
libtpu: 0.0.40
codegen_flags: <defaults>
</compile_context>

<pallas_src>
import numpy as np
import jax
import jax.numpy as jnp
from jax import lax
from jax.experimental import pallas as pl
from jax.experimental.pallas import tpu as pltpu


# ----------------------------------------------------------------------------
# Fused kernel: one-hot embedding gather + folded input projection + LSTM
# recurrence (PyTorch gate order i, f, g, o), single invocation.
# ----------------------------------------------------------------------------
def _fused_encoder_kernel(ids_ref, len_ref, emb_ref, embproj_ref, whh_ref,
                          b_ref, emb_out_ref, out_ref, hn_ref, cn_ref, pg_sc):
    """Shapes (static, derived from refs):
      ids_ref    : (T*B, 1) int32   time-major token ids
      len_ref    : (B, 1)   int32   sequence lengths
      emb_ref    : (V, E)   f32     embedding table
      embproj_ref: (V, 4H)  f32     emb_weight @ W_ih^T, g-block cols x2
      whh_ref    : (H, 4H)  bf16    W_hh^T, g-block cols x2
      b_ref      : (1, 4H)  f32     b_ih + b_hh, g-block x2
      emb_out_ref: (T*B, E) f32     time-major embeddings (output)
      out_ref    : (T, B, H) f32    time-major LSTM outputs, zeroed past length
      hn/cn      : (B, H)   f32     final valid hidden / cell state
      pg_sc      : (T, B, 4H) f32   VMEM scratch: hoisted pre-gates
    """
    T, B, H = out_ref.shape
    V, E = emb_ref.shape
    TB = T * B

    # ---- 1) one-hot (MXU) gather + folded input projection ------------------
    ids = ids_ref[...]                                             # (TB, 1)
    onehot = (ids == lax.broadcasted_iota(jnp.int32, (TB, V), 1)
              ).astype(jnp.float32)                                # (TB, V)

    # embedding gather (exact for 0/1 one-hot rows)
    emb_out_ref[...] = jnp.dot(onehot, emb_ref[...],
                               preferred_element_type=jnp.float32)  # (TB, E)

    # pre_gates = onehot @ (emb @ W_ih^T) + b   -- independent of the gather,
    # so the serial recurrence can start after ONE matmul.
    pg = jnp.dot(onehot, embproj_ref[...],
                 preferred_element_type=jnp.float32) + b_ref[...]   # (TB, 4H)

    # Static prologue copy into a (T, B, 4H) scratch so every per-step read
    # below is a sublane-aligned leading-axis index (B=4 is not 8-aligned).
    for t in range(T):
        pg_sc[t] = pg[t * B:(t + 1) * B, :]

    # ---- 2) serial recurrence: only h @ W_hh^T (bf16) per step ---------------
    lens = len_ref[...]                                            # (B, 1) once
    whh = whh_ref[...]                                             # (H, 4H) bf16

    def step(t, carry):
        h, c = carry                                               # (B, H) f32
        gates = pg_sc[t] + jnp.dot(h.astype(jnp.bfloat16), whh,
                                   preferred_element_type=jnp.float32)  # (B,4H)
        # ONE whole-vreg sigmoid over all 4 gates; g recovered via
        # tanh(x) = 2*sigmoid(2x) - 1 (g-block pre-activations were doubled).
        sg = jax.nn.sigmoid(gates)
        i_g = sg[:, 0 * H:1 * H]
        f_g = sg[:, 1 * H:2 * H]
        g_g = 2.0 * sg[:, 2 * H:3 * H] - 1.0
        o_g = sg[:, 3 * H:4 * H]
        c_new = f_g * c + i_g * g_g
        h_new = o_g * jnp.tanh(c_new)
        valid = lens > t                                           # (B, 1) bool
        out_ref[t] = jnp.where(valid, h_new, 0.0)                  # pad -> 0
        return jnp.where(valid, h_new, h), jnp.where(valid, c_new, c)

    h0 = jnp.zeros((B, H), jnp.float32)
    c0 = jnp.zeros((B, H), jnp.float32)
    h_fin, c_fin = lax.fori_loop(0, T, step, (h0, c0), unroll=True)
    hn_ref[...] = h_fin
    cn_ref[...] = c_fin


def _encoder_device(labels, lengths, emb_w, w_ih, w_hh, b_ih, b_hh):
    """labels: (B, T) int32 (T already bucketed), lengths: (B,) int32;
    PyTorch-layout LSTM weights. Returns output (B, T, H), h_n (1, B, H),
    c_n (1, B, H), embedded (B, T, E)."""
    B, T = labels.shape
    V, E = emb_w.shape
    H = w_hh.shape[1]
    G4 = 4 * H

    ids_tm = jnp.transpose(labels).reshape(T * B, 1).astype(jnp.int32)
    len_col = lengths.reshape(B, 1).astype(jnp.int32)

    # g-gate (columns 2H:3H) pre-scaled by 2 so the kernel can use one
    # whole-vreg sigmoid and recover tanh(x) = 2*sigmoid(2x) - 1.
    gate_scale = jnp.concatenate(
        [jnp.ones((H,), jnp.float32), jnp.ones((H,), jnp.float32),
         jnp.full((H,), 2.0, jnp.float32), jnp.ones((H,), jnp.float32)])

    wih_t = jnp.transpose(w_ih)                                   # (E, 4H)
    emb_proj = (emb_w @ wih_t) * gate_scale[None, :]              # (V, 4H) f32
    whh_scaled = (jnp.transpose(w_hh) * gate_scale[None, :]
                  ).astype(jnp.bfloat16)                          # (H, 4H) bf16
    bias = ((b_ih + b_hh) * gate_scale).reshape(1, G4)            # (1, 4H) f32

    emb_tm, out_tm, h_n, c_n = pl.pallas_call(
        _fused_encoder_kernel,
        out_shape=(
            jax.ShapeDtypeStruct((T * B, E), jnp.float32),
            jax.ShapeDtypeStruct((T, B, H), jnp.float32),
            jax.ShapeDtypeStruct((B, H), jnp.float32),
            jax.ShapeDtypeStruct((B, H), jnp.float32),
        ),
        grid_spec=pltpu.PrefetchScalarGridSpec(
            num_scalar_prefetch=0,
            grid=(1,),
            in_specs=[
                pl.BlockSpec((T * B, 1), lambda i: (0, 0)),       # ids (time-major)
                pl.BlockSpec((B, 1), lambda i: (0, 0)),           # lengths
                pl.BlockSpec((V, E), lambda i: (0, 0)),           # embedding table
                pl.BlockSpec((V, G4), lambda i: (0, 0)),          # emb @ W_ih^T (folded)
                pl.BlockSpec((H, G4), lambda i: (0, 0)),          # W_hh^T (bf16)
                pl.BlockSpec((1, G4), lambda i: (0, 0)),          # bias
            ],
            out_specs=(
                pl.BlockSpec((T * B, E), lambda i: (0, 0)),       # embedded (tm)
                pl.BlockSpec((T, B, H), lambda i: (0, 0, 0)),     # output (tm)
                pl.BlockSpec((B, H), lambda i: (0, 0)),           # h_n
                pl.BlockSpec((B, H), lambda i: (0, 0)),           # c_n
            ),
            scratch_shapes=[pltpu.VMEM((T, B, G4), jnp.float32)],
        ),
        compiler_params=pltpu.CompilerParams(
            dimension_semantics=("arbitrary",),
            vmem_limit_bytes=32 * 1024 * 1024),
    )(ids_tm, len_col, emb_w, emb_proj, whh_scaled, bias)

    embedded = jnp.transpose(emb_tm.reshape(T, B, E), (1, 0, 2))  # (B, T, E)
    output = jnp.transpose(out_tm, (1, 0, 2))                     # (B, T, H)
    return output, h_n[None], c_n[None], embedded


_encoder_device_jit = jax.jit(_encoder_device)


# ----------------------------------------------------------------------------
# RNNEncoder forward (Pallas-backed)
# ----------------------------------------------------------------------------
def rnn_encoder_forward(input_labels, params, pad_id=0, bucket=8):
    """input_labels: (B, S) int host array. Returns
    (output, (h_n, c_n), embedded) matching the PyTorch forward."""
    labels_np = np.array(input_labels)              # writable host copy
    lengths_np = (labels_np != pad_id).sum(axis=1).astype(np.int32)
    max_len = int(lengths_np.max())
    B = labels_np.shape[0]

    # Bucket the compiled time extent to multiples of `bucket` so serving-style
    # inputs with varying max_len hit a small set of static shapes (no
    # per-length recompiles); masked extra steps are cheap and sliced off.
    T_run = max(bucket, ((max_len + bucket - 1) // bucket) * bucket)
    labels_run = np.full((B, T_run), pad_id, dtype=np.int32)
    labels_run[:, :max_len] = labels_np[:, :max_len]

    labels = jnp.asarray(labels_run)
    lengths = jnp.asarray(lengths_np, dtype=jnp.int32)

    # input_dropout_p = 0 -> identity (eval-mode dropout)
    output, h_n, c_n, embedded = _encoder_device_jit(
        labels, lengths, params["emb_weight"], params["w_ih"],
        params["w_hh"], params["b_ih"], params["b_hh"])

    # Slice back to the data-dependent max_len, as in the PyTorch forward.
    return output[:, :max_len], (h_n, c_n), embedded[:, :max_len]


# ----------------------------------------------------------------------------
# Pure-JAX reference (sanity check of the Pallas kernel), full f32.
# ----------------------------------------------------------------------------
def _ref_forward(labels, lengths, params):
    emb = jnp.take(params["emb_weight"], labels, axis=0)
    wih_t = params["w_ih"].T
    whh_t = params["w_hh"].T
    b = (params["b_ih"] + params["b_hh"])[None, :]
    B, T, E = emb.shape
    H = params["w_hh"].shape[1]

    def step(carry, t):
        h, c = carry
        xt = emb[:, t]
        gates = xt @ wih_t + h @ whh_t + b
        i = jax.nn.sigmoid(gates[:, :H])
        f = jax.nn.sigmoid(gates[:, H:2 * H])
        g = jnp.tanh(gates[:, 2 * H:3 * H])
        o = jax.nn.sigmoid(gates[:, 3 * H:])
        c_new = f * c + i * g
        h_new = o * jnp.tanh(c_new)
        valid = (lengths > t)[:, None]
        h = jnp.where(valid, h_new, h)
        c = jnp.where(valid, c_new, c)
        out_t = jnp.where(valid, h_new, 0.0)
        return (h, c), out_t

    (h, c), outs = lax.scan(step, (jnp.zeros((B, H)), jnp.zeros((B, H))),
                            jnp.arange(T))
    return jnp.transpose(outs, (1, 0, 2)), h, c, emb


if __name__ == "__main__":
    # Module hyperparameters (small, consistent with the forward pass)
    vocab_size = 32
    word_embedding_size = 32     # E
    hidden_size = 32             # H  (4H = 128 lanes, B*H = 128)
    n_spec_token = 4             # unused when fix_embedding=False
    pad_id = 0
    B, S = 4, 10                 # batch, (padded) seq length

    key = jax.random.PRNGKey(0)
    k_emb, k_wih, k_whh, k_bih, k_bhh, k_lbl = jax.random.split(key, 6)

    bound = 1.0 / np.sqrt(hidden_size)
    params = {
        "emb_weight": jax.random.normal(
            k_emb, (vocab_size, word_embedding_size), dtype=jnp.float32),
        "w_ih": jax.random.uniform(
            k_wih, (4 * hidden_size, word_embedding_size),
            minval=-bound, maxval=bound, dtype=jnp.float32),
        "w_hh": jax.random.uniform(
            k_whh, (4 * hidden_size, hidden_size),
            minval=-bound, maxval=bound, dtype=jnp.float32),
        "b_ih": jax.random.uniform(
            k_bih, (4 * hidden_size,), minval=-bound, maxval=bound,
            dtype=jnp.float32),
        "b_hh": jax.random.uniform(
            k_bhh, (4 * hidden_size,), minval=-bound, maxval=bound,
            dtype=jnp.float32),
    }

    # Deterministic variable-length labels padded with pad_id=0 (writable copy).
    labels = np.array(
        jax.random.randint(k_lbl, (B, S), 1, vocab_size, dtype=jnp.int32))
    seq_lens = np.array([S, 7, 5, 3])
    for b in range(B):
        labels[b, seq_lens[b]:] = pad_id

    output, (h_n, c_n), embedded = rnn_encoder_forward(labels, params, pad_id)
    jax.block_until_ready((output, h_n, c_n, embedded))

    # Sanity check against the pure-f32 JAX reference.
    max_len = int(seq_lens.max())
    ref_out, ref_h, ref_c, ref_emb = _ref_forward(
        jnp.asarray(labels[:, :max_len], dtype=jnp.int32),
        jnp.asarray(seq_lens, dtype=jnp.int32), params)
    assert output.shape == (B, max_len, hidden_size)
    assert h_n.shape == (1, B, hidden_size) and c_n.shape == (1, B, hidden_size)
    assert embedded.shape == (B, max_len, word_embedding_size)
    # Embedding gather is exact -> tight tolerance.
    np.testing.assert_allclose(np.asarray(embedded), np.asarray(ref_emb),
                               rtol=1e-5, atol=1e-5)
    # Recurrent matmul runs in bf16 -> loosened tolerance (per perf review).
    np.testing.assert_allclose(np.asarray(output), np.asarray(ref_out),
                               rtol=5e-2, atol=5e-2)
    np.testing.assert_allclose(np.asarray(h_n[0]), np.asarray(ref_h),
                               rtol=5e-2, atol=5e-2)
    np.testing.assert_allclose(np.asarray(c_n[0]), np.asarray(ref_c),
                               rtol=5e-2, atol=5e-2)

    print("KERNEL_OK")
</pallas_src>

<mosaic_0001>
module attributes {stable_mosaic.version = 11 : i64} {
  func.func @_fused_encoder_kernel(%arg0: i32, %arg1: memref<64x1xi32, #tpu.memory_space<vmem>>, %arg2: memref<4x1xi32, #tpu.memory_space<vmem>>, %arg3: memref<32x32xf32, #tpu.memory_space<vmem>>, %arg4: memref<32x128xf32, #tpu.memory_space<vmem>>, %arg5: memref<32x128xbf16, #tpu.memory_space<vmem>>, %arg6: memref<1x128xf32, #tpu.memory_space<vmem>>, %arg7: memref<64x32xf32, #tpu.memory_space<vmem>>, %arg8: memref<16x4x32xf32, #tpu.memory_space<vmem>>, %arg9: memref<4x32xf32, #tpu.memory_space<vmem>>, %arg10: memref<4x32xf32, #tpu.memory_space<vmem>>, %arg11: memref<16x4x128xf32, #tpu.memory_space<vmem>>) attributes {dimension_semantics = [#tpu.dimension_semantics<arbitrary>], iteration_bounds = array<i64: 1>, scalar_prefetch = 0 : i64, scratch_operands = 1 : i64, tpu.core_type = #tpu.core_type<tc>, window_params = [{pipeline_mode = #tpu.pipeline_mode<synchronous>, transform_indices = @transform_0, window_bounds = array<i64: 64, 1>}, {pipeline_mode = #tpu.pipeline_mode<synchronous>, transform_indices = @transform_1, window_bounds = array<i64: 4, 1>}, {pipeline_mode = #tpu.pipeline_mode<synchronous>, transform_indices = @transform_2, window_bounds = array<i64: 32, 32>}, {pipeline_mode = #tpu.pipeline_mode<synchronous>, transform_indices = @transform_3, window_bounds = array<i64: 32, 128>}, {pipeline_mode = #tpu.pipeline_mode<synchronous>, transform_indices = @transform_4, window_bounds = array<i64: 32, 128>}, {pipeline_mode = #tpu.pipeline_mode<synchronous>, transform_indices = @transform_5, window_bounds = array<i64: 1, 128>}, {pipeline_mode = #tpu.pipeline_mode<synchronous>, transform_indices = @transform_6, window_bounds = array<i64: 64, 32>}, {pipeline_mode = #tpu.pipeline_mode<synchronous>, transform_indices = @transform_7, window_bounds = array<i64: 16, 4, 32>}, {pipeline_mode = #tpu.pipeline_mode<synchronous>, transform_indices = @transform_8, window_bounds = array<i64: 4, 32>}, {pipeline_mode = #tpu.pipeline_mode<synchronous>, transform_indices = @transform_9, window_bounds = array<i64: 4, 32>}]} {
    %c0 = arith.constant 0 : index
    %c0_0 = arith.constant 0 : index
    %0 = vector.load %arg1[%c0, %c0_0] : memref<64x1xi32, #tpu.memory_space<vmem>>, vector<64x1xi32>
    %1 = tpu.iota {dimensions = array<i32: 1>} : vector<64x32xi32>
    %2 = vector.broadcast %0 : vector<64x1xi32> to vector<64x32xi32>
    %3 = arith.cmpi eq, %2, %1 : vector<64x32xi32>
    %4 = arith.extui %3 : vector<64x32xi1> to vector<64x32xi32>
    %5 = arith.sitofp %4 : vector<64x32xi32> to vector<64x32xf32>
    %c0_1 = arith.constant 0 : index
    %c0_2 = arith.constant 0 : index
    %6 = vector.load %arg3[%c0_1, %c0_2] : memref<32x32xf32, #tpu.memory_space<vmem>>, vector<32x32xf32>
    %cst = arith.constant dense<0.000000e+00> : vector<64x32xf32>
    %7 = tpu.matmul %5, %6, %cst {dimension_numbers = #tpu.dot_dimension_numbers<[1], [0], [0], [1], [0, 0, 1, 1], [], []>} : vector<64x32xf32>, vector<32x32xf32>, vector<64x32xf32> -> vector<64x32xf32>
    %c0_3 = arith.constant 0 : index
    %c0_4 = arith.constant 0 : index
    %8 = vector.load %arg7[%c0_3, %c0_4] : memref<64x32xf32, #tpu.memory_space<vmem>>, vector<64x32xf32>
    tpu.vector_store %arg7[%c0_3, %c0_4], %7 {strides = array<i32>} : memref<64x32xf32, #tpu.memory_space<vmem>>, vector<64x32xf32>,
    %c0_5 = arith.constant 0 : index
    %c0_6 = arith.constant 0 : index
    %9 = vector.load %arg4[%c0_5, %c0_6] : memref<32x128xf32, #tpu.memory_space<vmem>>, vector<32x128xf32>
    %cst_7 = arith.constant dense<0.000000e+00> : vector<64x128xf32>
    %10 = tpu.matmul %5, %9, %cst_7 {dimension_numbers = #tpu.dot_dimension_numbers<[1], [0], [0], [1], [0, 0, 1, 1], [], []>} : vector<64x32xf32>, vector<32x128xf32>, vector<64x128xf32> -> vector<64x128xf32>
    %c0_8 = arith.constant 0 : index
    %c0_9 = arith.constant 0 : index
    %11 = vector.load %arg6[%c0_8, %c0_9] : memref<1x128xf32, #tpu.memory_space<vmem>>, vector<1x128xf32>
    %12 = vector.broadcast %11 : vector<1x128xf32> to vector<64x128xf32>
    %13 = arith.addf %10, %12 : vector<64x128xf32>
    %14 = vector.extract_strided_slice %13 {offsets = [0, 0], sizes = [4, 128], strides = [1, 1]} : vector<64x128xf32> to vector<4x128xf32>
    %c0_10 = arith.constant 0 : index
    %c0_11 = arith.constant 0 : index
    %c0_12 = arith.constant 0 : index
    %15 = vector.load %arg11[%c0_10, %c0_11, %c0_12] : memref<16x4x128xf32, #tpu.memory_space<vmem>>, vector<1x4x128xf32>
    %16 = vector.shape_cast %15 : vector<1x4x128xf32> to vector<4x128xf32>
    %17 = vector.shape_cast %14 : vector<4x128xf32> to vector<1x4x128xf32>
    tpu.vector_store %arg11[%c0_10, %c0_11, %c0_12], %17 {strides = array<i32>} : memref<16x4x128xf32, #tpu.memory_space<vmem>>, vector<1x4x128xf32>,
    %18 = vector.extract_strided_slice %13 {offsets = [4, 0], sizes = [4, 128], strides = [1, 1]} : vector<64x128xf32> to vector<4x128xf32>
    %c1 = arith.constant 1 : index
    %c0_13 = arith.constant 0 : index
    %c0_14 = arith.constant 0 : index
    %19 = vector.load %arg11[%c1, %c0_13, %c0_14] : memref<16x4x128xf32, #tpu.memory_space<vmem>>, vector<1x4x128xf32>
    %20 = vector.shape_cast %19 : vector<1x4x128xf32> to vector<4x128xf32>
    %21 = vector.shape_cast %18 : vector<4x128xf32> to vector<1x4x128xf32>
    tpu.vector_store %arg11[%c1, %c0_13, %c0_14], %21 {strides = array<i32>} : memref<16x4x128xf32, #tpu.memory_space<vmem>>, vector<1x4x128xf32>,
    %22 = vector.extract_strided_slice %13 {offsets = [8, 0], sizes = [4, 128], strides = [1, 1]} : vector<64x128xf32> to vector<4x128xf32>
    %c2 = arith.constant 2 : index
    %c0_15 = arith.constant 0 : index
    %c0_16 = arith.constant 0 : index
    %23 = vector.load %arg11[%c2, %c0_15, %c0_16] : memref<16x4x128xf32, #tpu.memory_space<vmem>>, vector<1x4x128xf32>
    %24 = vector.shape_cast %23 : vector<1x4x128xf32> to vector<4x128xf32>
    %25 = vector.shape_cast %22 : vector<4x128xf32> to vector<1x4x128xf32>
    tpu.vector_store %arg11[%c2, %c0_15, %c0_16], %25 {strides = array<i32>} : memref<16x4x128xf32, #tpu.memory_space<vmem>>, vector<1x4x128xf32>,
    %26 = vector.extract_strided_slice %13 {offsets = [12, 0], sizes = [4, 128], strides = [1, 1]} : vector<64x128xf32> to vector<4x128xf32>
    %c3 = arith.constant 3 : index
    %c0_17 = arith.constant 0 : index
    %c0_18 = arith.constant 0 : index
    %27 = vector.load %arg11[%c3, %c0_17, %c0_18] : memref<16x4x128xf32, #tpu.memory_space<vmem>>, vector<1x4x128xf32>
    %28 = vector.shape_cast %27 : vector<1x4x128xf32> to vector<4x128xf32>
    %29 = vector.shape_cast %26 : vector<4x128xf32> to vector<1x4x128xf32>
    tpu.vector_store %arg11[%c3, %c0_17, %c0_18], %29 {strides = array<i32>} : memref<16x4x128xf32, #tpu.memory_space<vmem>>, vector<1x4x128xf32>,
    %30 = vector.extract_strided_slice %13 {offsets = [16, 0], sizes = [4, 128], strides = [1, 1]} : vector<64x128xf32> to vector<4x128xf32>
    %c4 = arith.constant 4 : index
    %c0_19 = arith.constant 0 : index
    %c0_20 = arith.constant 0 : index
    %31 = vector.load %arg11[%c4, %c0_19, %c0_20] : memref<16x4x128xf32, #tpu.memory_space<vmem>>, vector<1x4x128xf32>
    %32 = vector.shape_cast %31 : vector<1x4x128xf32> to vector<4x128xf32>
    %33 = vector.shape_cast %30 : vector<4x128xf32> to vector<1x4x128xf32>
    tpu.vector_store %arg11[%c4, %c0_19, %c0_20], %33 {strides = array<i32>} : memref<16x4x128xf32, #tpu.memory_space<vmem>>, vector<1x4x128xf32>,
    %34 = vector.extract_strided_slice %13 {offsets = [20, 0], sizes = [4, 128], strides = [1, 1]} : vector<64x128xf32> to vector<4x128xf32>
    %c5 = arith.constant 5 : index
    %c0_21 = arith.constant 0 : index
    %c0_22 = arith.constant 0 : index
    %35 = vector.load %arg11[%c5, %c0_21, %c0_22] : memref<16x4x128xf32, #tpu.memory_space<vmem>>, vector<1x4x128xf32>
    %36 = vector.shape_cast %35 : vector<1x4x128xf32> to vector<4x128xf32>
    %37 = vector.shape_cast %34 : vector<4x128xf32> to vector<1x4x128xf32>
    tpu.vector_store %arg11[%c5, %c0_21, %c0_22], %37 {strides = array<i32>} : memref<16x4x128xf32, #tpu.memory_space<vmem>>, vector<1x4x128xf32>,
    %38 = vector.extract_strided_slice %13 {offsets = [24, 0], sizes = [4, 128], strides = [1, 1]} : vector<64x128xf32> to vector<4x128xf32>
    %c6 = arith.constant 6 : index
    %c0_23 = arith.constant 0 : index
    %c0_24 = arith.constant 0 : index
    %39 = vector.load %arg11[%c6, %c0_23, %c0_24] : memref<16x4x128xf32, #tpu.memory_space<vmem>>, vector<1x4x128xf32>
    %40 = vector.shape_cast %39 : vector<1x4x128xf32> to vector<4x128xf32>
    %41 = vector.shape_cast %38 : vector<4x128xf32> to vector<1x4x128xf32>
    tpu.vector_store %arg11[%c6, %c0_23, %c0_24], %41 {strides = array<i32>} : memref<16x4x128xf32, #tpu.memory_space<vmem>>, vector<1x4x128xf32>,
    %42 = vector.extract_strided_slice %13 {offsets = [28, 0], sizes = [4, 128], strides = [1, 1]} : vector<64x128xf32> to vector<4x128xf32>
    %c7 = arith.constant 7 : index
    %c0_25 = arith.constant 0 : index
    %c0_26 = arith.constant 0 : index
    %43 = vector.load %arg11[%c7, %c0_25, %c0_26] : memref<16x4x128xf32, #tpu.memory_space<vmem>>, vector<1x4x128xf32>
    %44 = vector.shape_cast %43 : vector<1x4x128xf32> to vector<4x128xf32>
    %45 = vector.shape_cast %42 : vector<4x128xf32> to vector<1x4x128xf32>
    tpu.vector_store %arg11[%c7, %c0_25, %c0_26], %45 {strides = array<i32>} : memref<16x4x128xf32, #tpu.memory_space<vmem>>, vector<1x4x128xf32>,
    %46 = vector.extract_strided_slice %13 {offsets = [32, 0], sizes = [4, 128], strides = [1, 1]} : vector<64x128xf32> to vector<4x128xf32>
    %c8 = arith.constant 8 : index
    %c0_27 = arith.constant 0 : index
    %c0_28 = arith.constant 0 : index
    %47 = vector.load %arg11[%c8, %c0_27, %c0_28] : memref<16x4x128xf32, #tpu.memory_space<vmem>>, vector<1x4x128xf32>
    %48 = vector.shape_cast %47 : vector<1x4x128xf32> to vector<4x128xf32>
    %49 = vector.shape_cast %46 : vector<4x128xf32> to vector<1x4x128xf32>
    tpu.vector_store %arg11[%c8, %c0_27, %c0_28], %49 {strides = array<i32>} : memref<16x4x128xf32, #tpu.memory_space<vmem>>, vector<1x4x128xf32>,
    %50 = vector.extract_strided_slice %13 {offsets = [36, 0], sizes = [4, 128], strides = [1, 1]} : vector<64x128xf32> to vector<4x128xf32>
    %c9 = arith.constant 9 : index
    %c0_29 = arith.constant 0 : index
    %c0_30 = arith.constant 0 : index
    %51 = vector.load %arg11[%c9, %c0_29, %c0_30] : memref<16x4x128xf32, #tpu.memory_space<vmem>>, vector<1x4x128xf32>
    %52 = vector.shape_cast %51 : vector<1x4x128xf32> to vector<4x128xf32>
    %53 = vector.shape_cast %50 : vector<4x128xf32> to vector<1x4x128xf32>
    tpu.vector_store %arg11[%c9, %c0_29, %c0_30], %53 {strides = array<i32>} : memref<16x4x128xf32, #tpu.memory_space<vmem>>, vector<1x4x128xf32>,
    %54 = vector.extract_strided_slice %13 {offsets = [40, 0], sizes = [4, 128], strides = [1, 1]} : vector<64x128xf32> to vector<4x128xf32>
    %c10 = arith.constant 10 : index
    %c0_31 = arith.constant 0 : index
    %c0_32 = arith.constant 0 : index
    %55 = vector.load %arg11[%c10, %c0_31, %c0_32] : memref<16x4x128xf32, #tpu.memory_space<vmem>>, vector<1x4x128xf32>
    %56 = vector.shape_cast %55 : vector<1x4x128xf32> to vector<4x128xf32>
    %57 = vector.shape_cast %54 : vector<4x128xf32> to vector<1x4x128xf32>
    tpu.vector_store %arg11[%c10, %c0_31, %c0_32], %57 {strides = array<i32>} : memref<16x4x128xf32, #tpu.memory_space<vmem>>, vector<1x4x128xf32>,
    %58 = vector.extract_strided_slice %13 {offsets = [44, 0], sizes = [4, 128], strides = [1, 1]} : vector<64x128xf32> to vector<4x128xf32>
    %c11 = arith.constant 11 : index
    %c0_33 = arith.constant 0 : index
    %c0_34 = arith.constant 0 : index
    %59 = vector.load %arg11[%c11, %c0_33, %c0_34] : memref<16x4x128xf32, #tpu.memory_space<vmem>>, vector<1x4x128xf32>
    %60 = vector.shape_cast %59 : vector<1x4x128xf32> to vector<4x128xf32>
    %61 = vector.shape_cast %58 : vector<4x128xf32> to vector<1x4x128xf32>
    tpu.vector_store %arg11[%c11, %c0_33, %c0_34], %61 {strides = array<i32>} : memref<16x4x128xf32, #tpu.memory_space<vmem>>, vector<1x4x128xf32>,
    %62 = vector.extract_strided_slice %13 {offsets = [48, 0], sizes = [4, 128], strides = [1, 1]} : vector<64x128xf32> to vector<4x128xf32>
    %c12 = arith.constant 12 : index
    %c0_35 = arith.constant 0 : index
    %c0_36 = arith.constant 0 : index
    %63 = vector.load %arg11[%c12, %c0_35, %c0_36] : memref<16x4x128xf32, #tpu.memory_space<vmem>>, vector<1x4x128xf32>
    %64 = vector.shape_cast %63 : vector<1x4x128xf32> to vector<4x128xf32>
    %65 = vector.shape_cast %62 : vector<4x128xf32> to vector<1x4x128xf32>
    tpu.vector_store %arg11[%c12, %c0_35, %c0_36], %65 {strides = array<i32>} : memref<16x4x128xf32, #tpu.memory_space<vmem>>, vector<1x4x128xf32>,
    %66 = vector.extract_strided_slice %13 {offsets = [52, 0], sizes = [4, 128], strides = [1, 1]} : vector<64x128xf32> to vector<4x128xf32>
    %c13 = arith.constant 13 : index
    %c0_37 = arith.constant 0 : index
    %c0_38 = arith.constant 0 : index
    %67 = vector.load %arg11[%c13, %c0_37, %c0_38] : memref<16x4x128xf32, #tpu.memory_space<vmem>>, vector<1x4x128xf32>
    %68 = vector.shape_cast %67 : vector<1x4x128xf32> to vector<4x128xf32>
    %69 = vector.shape_cast %66 : vector<4x128xf32> to vector<1x4x128xf32>
    tpu.vector_store %arg11[%c13, %c0_37, %c0_38], %69 {strides = array<i32>} : memref<16x4x128xf32, #tpu.memory_space<vmem>>, vector<1x4x128xf32>,
    %70 = vector.extract_strided_slice %13 {offsets = [56, 0], sizes = [4, 128], strides = [1, 1]} : vector<64x128xf32> to vector<4x128xf32>
    %c14 = arith.constant 14 : index
    %c0_39 = arith.constant 0 : index
    %c0_40 = arith.constant 0 : index
    %71 = vector.load %arg11[%c14, %c0_39, %c0_40] : memref<16x4x128xf32, #tpu.memory_space<vmem>>, vector<1x4x128xf32>
    %72 = vector.shape_cast %71 : vector<1x4x128xf32> to vector<4x128xf32>
    %73 = vector.shape_cast %70 : vector<4x128xf32> to vector<1x4x128xf32>
    tpu.vector_store %arg11[%c14, %c0_39, %c0_40], %73 {strides = array<i32>} : memref<16x4x128xf32, #tpu.memory_space<vmem>>, vector<1x4x128xf32>,
    %74 = vector.extract_strided_slice %13 {offsets = [60, 0], sizes = [4, 128], strides = [1, 1]} : vector<64x128xf32> to vector<4x128xf32>
    %c15 = arith.constant 15 : index
    %c0_41 = arith.constant 0 : index
    %c0_42 = arith.constant 0 : index
    %75 = vector.load %arg11[%c15, %c0_41, %c0_42] : memref<16x4x128xf32, #tpu.memory_space<vmem>>, vector<1x4x128xf32>
    %76 = vector.shape_cast %75 : vector<1x4x128xf32> to vector<4x128xf32>
    %77 = vector.shape_cast %74 : vector<4x128xf32> to vector<1x4x128xf32>
    tpu.vector_store %arg11[%c15, %c0_41, %c0_42], %77 {strides = array<i32>} : memref<16x4x128xf32, #tpu.memory_space<vmem>>, vector<1x4x128xf32>,
    %c0_43 = arith.constant 0 : index
    %c0_44 = arith.constant 0 : index
    %78 = vector.load %arg2[%c0_43, %c0_44] : memref<4x1xi32, #tpu.memory_space<vmem>>, vector<4x1xi32>
    %c0_45 = arith.constant 0 : index
    %c0_46 = arith.constant 0 : index
    %79 = vector.load %arg5[%c0_45, %c0_46] : memref<32x128xbf16, #tpu.memory_space<vmem>>, vector<32x128xbf16>
    %cst_47 = arith.constant 0.000000e+00 : f32
    %80 = vector.broadcast %cst_47 : f32 to vector<4x32xf32>
    %cst_48 = arith.constant 0.000000e+00 : f32
    %81 = vector.broadcast %cst_48 : f32 to vector<4x32xf32>
    %c0_i32 = arith.constant 0 : i32
    %82 = arith.index_cast %c0_i32 : i32 to index
    %c0_49 = arith.constant 0 : index
    %c0_50 = arith.constant 0 : index
    %83 = vector.load %arg11[%82, %c0_49, %c0_50] : memref<16x4x128xf32, #tpu.memory_space<vmem>>, vector<1x4x128xf32>
    %84 = vector.shape_cast %83 : vector<1x4x128xf32> to vector<4x128xf32>
    %85 = arith.truncf %80 : vector<4x32xf32> to vector<4x32xbf16>
    %cst_51 = arith.constant dense<0.000000e+00> : vector<4x128xf32>
    %86 = tpu.matmul %85, %79, %cst_51 {dimension_numbers = #tpu.dot_dimension_numbers<[1], [0], [0], [1], [0, 0, 1, 1], [], []>} : vector<4x32xbf16>, vector<32x128xbf16>, vector<4x128xf32> -> vector<4x128xf32>
    %87 = arith.addf %84, %86 : vector<4x128xf32>
    %88 = arith.negf %87 : vector<4x128xf32>
    %89 = math.exp %88 : vector<4x128xf32>
    %cst_52 = arith.constant 1.000000e+00 : f32
    %90 = vector.broadcast %cst_52 : f32 to vector<4x128xf32>
    %91 = arith.addf %90, %89 : vector<4x128xf32>
    %92 = arith.divf %90, %91 : vector<4x128xf32>
    %93 = vector.extract_strided_slice %92 {offsets = [0, 0], sizes = [4, 32], strides = [1, 1]} : vector<4x128xf32> to vector<4x32xf32>
    %94 = vector.extract_strided_slice %92 {offsets = [0, 32], sizes = [4, 32], strides = [1, 1]} : vector<4x128xf32> to vector<4x32xf32>
    %95 = vector.extract_strided_slice %92 {offsets = [0, 64], sizes = [4, 32], strides = [1, 1]} : vector<4x128xf32> to vector<4x32xf32>
    %cst_53 = arith.constant 2.000000e+00 : f32
    %96 = vector.broadcast %cst_53 : f32 to vector<4x32xf32>
    %97 = arith.mulf %96, %95 : vector<4x32xf32>
    %cst_54 = arith.constant 1.000000e+00 : f32
    %98 = vector.broadcast %cst_54 : f32 to vector<4x32xf32>
    %99 = arith.subf %97, %98 : vector<4x32xf32>
    %100 = vector.extract_strided_slice %92 {offsets = [0, 96], sizes = [4, 32], strides = [1, 1]} : vector<4x128xf32> to vector<4x32xf32>
    %101 = arith.mulf %94, %81 : vector<4x32xf32>
    %102 = arith.mulf %93, %99 : vector<4x32xf32>
    %103 = arith.addf %101, %102 : vector<4x32xf32>
    %104 = math.tanh %103 : vector<4x32xf32>
    %105 = arith.mulf %100, %104 : vector<4x32xf32>
    %106 = vector.broadcast %c0_i32 : i32 to vector<4x1xi32>
    %107 = arith.cmpi sgt, %78, %106 : vector<4x1xi32>
    %cst_55 = arith.constant 0.000000e+00 : f32
    %108 = vector.shape_cast %107 : vector<4x1xi1> to vector<4x1xi1>
    %109 = vector.broadcast %108 : vector<4x1xi1> to vector<4x32xi1>
    %110 = vector.broadcast %cst_55 : f32 to vector<4x32xf32>
    %111 = arith.select %109, %105, %110 : vector<4x32xi1>, vector<4x32xf32>
    %112 = arith.index_cast %c0_i32 : i32 to index
    %c0_56 = arith.constant 0 : index
    %c0_57 = arith.constant 0 : index
    %113 = vector.load %arg8[%112, %c0_56, %c0_57] : memref<16x4x32xf32, #tpu.memory_space<vmem>>, vector<1x4x32xf32>
    %114 = vector.shape_cast %113 : vector<1x4x32xf32> to vector<4x32xf32>
    %115 = vector.shape_cast %111 : vector<4x32xf32> to vector<1x4x32xf32>
    tpu.vector_store %arg8[%112, %c0_56, %c0_57], %115 {strides = array<i32>} : memref<16x4x32xf32, #tpu.memory_space<vmem>>, vector<1x4x32xf32>,
    %116 = vector.shape_cast %107 : vector<4x1xi1> to vector<4x1xi1>
    %117 = vector.broadcast %116 : vector<4x1xi1> to vector<4x32xi1>
    %118 = arith.select %117, %105, %80 : vector<4x32xi1>, vector<4x32xf32>
    %119 = vector.shape_cast %107 : vector<4x1xi1> to vector<4x1xi1>
    %120 = vector.broadcast %119 : vector<4x1xi1> to vector<4x32xi1>
    %121 = arith.select %120, %103, %81 : vector<4x32xi1>, vector<4x32xf32>
    %c1_i32 = arith.constant 1 : i32
    %122 = arith.index_cast %c1_i32 : i32 to index
    %c0_58 = arith.constant 0 : index
    %c0_59 = arith.constant 0 : index
    %123 = vector.load %arg11[%122, %c0_58, %c0_59] : memref<16x4x128xf32, #tpu.memory_space<vmem>>, vector<1x4x128xf32>
    %124 = vector.shape_cast %123 : vector<1x4x128xf32> to vector<4x128xf32>
    %125 = arith.truncf %118 : vector<4x32xf32> to vector<4x32xbf16>
    %cst_60 = arith.constant dense<0.000000e+00> : vector<4x128xf32>
    %126 = tpu.matmul %125, %79, %cst_60 {dimension_numbers = #tpu.dot_dimension_numbers<[1], [0], [0], [1], [0, 0, 1, 1], [], []>} : vector<4x32xbf16>, vector<32x128xbf16>, vector<4x128xf32> -> vector<4x128xf32>
    %127 = arith.addf %124, %126 : vector<4x128xf32>
    %128 = arith.negf %127 : vector<4x128xf32>
    %129 = math.exp %128 : vector<4x128xf32>
    %cst_61 = arith.constant 1.000000e+00 : f32
    %130 = vector.broadcast %cst_61 : f32 to vector<4x128xf32>
    %131 = arith.addf %130, %129 : vector<4x128xf32>
    %132 = arith.divf %130, %131 : vector<4x128xf32>
    %133 = vector.extract_strided_slice %132 {offsets = [0, 0], sizes = [4, 32], strides = [1, 1]} : vector<4x128xf32> to vector<4x32xf32>
    %134 = vector.extract_strided_slice %132 {offsets = [0, 32], sizes = [4, 32], strides = [1, 1]} : vector<4x128xf32> to vector<4x32xf32>
    %135 = vector.extract_strided_slice %132 {offsets = [0, 64], sizes = [4, 32], strides = [1, 1]} : vector<4x128xf32> to vector<4x32xf32>
    %cst_62 = arith.constant 2.000000e+00 : f32
    %136 = vector.broadcast %cst_62 : f32 to vector<4x32xf32>
    %137 = arith.mulf %136, %135 : vector<4x32xf32>
    %cst_63 = arith.constant 1.000000e+00 : f32
    %138 = vector.broadcast %cst_63 : f32 to vector<4x32xf32>
    %139 = arith.subf %137, %138 : vector<4x32xf32>
    %140 = vector.extract_strided_slice %132 {offsets = [0, 96], sizes = [4, 32], strides = [1, 1]} : vector<4x128xf32> to vector<4x32xf32>
    %141 = arith.mulf %134, %121 : vector<4x32xf32>
    %142 = arith.mulf %133, %139 : vector<4x32xf32>
    %143 = arith.addf %141, %142 : vector<4x32xf32>
    %144 = math.tanh %143 : vector<4x32xf32>
    %145 = arith.mulf %140, %144 : vector<4x32xf32>
    %146 = vector.broadcast %c1_i32 : i32 to vector<4x1xi32>
    %147 = arith.cmpi sgt, %78, %146 : vector<4x1xi32>
    %cst_64 = arith.constant 0.000000e+00 : f32
    %148 = vector.shape_cast %147 : vector<4x1xi1> to vector<4x1xi1>
    %149 = vector.broadcast %148 : vector<4x1xi1> to vector<4x32xi1>
    %150 = vector.broadcast %cst_64 : f32 to vector<4x32xf32>
    %151 = arith.select %149, %145, %150 : vector<4x32xi1>, vector<4x32xf32>
    %152 = arith.index_cast %c1_i32 : i32 to index
    %c0_65 = arith.constant 0 : index
    %c0_66 = arith.constant 0 : index
    %153 = vector.load %arg8[%152, %c0_65, %c0_66] : memref<16x4x32xf32, #tpu.memory_space<vmem>>, vector<1x4x32xf32>
    %154 = vector.shape_cast %153 : vector<1x4x32xf32> to vector<4x32xf32>
    %155 = vector.shape_cast %151 : vector<4x32xf32> to vector<1x4x32xf32>
    tpu.vector_store %arg8[%152, %c0_65, %c0_66], %155 {strides = array<i32>} : memref<16x4x32xf32, #tpu.memory_space<vmem>>, vector<1x4x32xf32>,
    %156 = vector.shape_cast %147 : vector<4x1xi1> to vector<4x1xi1>
    %157 = vector.broadcast %156 : vector<4x1xi1> to vector<4x32xi1>
    %158 = arith.select %157, %145, %118 : vector<4x32xi1>, vector<4x32xf32>
    %159 = vector.shape_cast %147 : vector<4x1xi1> to vector<4x1xi1>
    %160 = vector.broadcast %159 : vector<4x1xi1> to vector<4x32xi1>
    %161 = arith.select %160, %143, %121 : vector<4x32xi1>, vector<4x32xf32>
    %c2_i32 = arith.constant 2 : i32
    %162 = arith.index_cast %c2_i32 : i32 to index
    %c0_67 = arith.constant 0 : index
    %c0_68 = arith.constant 0 : index
    %163 = vector.load %arg11[%162, %c0_67, %c0_68] : memref<16x4x128xf32, #tpu.memory_space<vmem>>, vector<1x4x128xf32>
    %164 = vector.shape_cast %163 : vector<1x4x128xf32> to vector<4x128xf32>
    %165 = arith.truncf %158 : vector<4x32xf32> to vector<4x32xbf16>
    %cst_69 = arith.constant dense<0.000000e+00> : vector<4x128xf32>
    %166 = tpu.matmul %165, %79, %cst_69 {dimension_numbers = #tpu.dot_dimension_numbers<[1], [0], [0], [1], [0, 0, 1, 1], [], []>} : vector<4x32xbf16>, vector<32x128xbf16>, vector<4x128xf32> -> vector<4x128xf32>
    %167 = arith.addf %164, %166 : vector<4x128xf32>
    %168 = arith.negf %167 : vector<4x128xf32>
    %169 = math.exp %168 : vector<4x128xf32>
    %cst_70 = arith.constant 1.000000e+00 : f32
    %170 = vector.broadcast %cst_70 : f32 to vector<4x128xf32>
    %171 = arith.addf %170, %169 : vector<4x128xf32>
    %172 = arith.divf %170, %171 : vector<4x128xf32>
    %173 = vector.extract_strided_slice %172 {offsets = [0, 0], sizes = [4, 32], strides = [1, 1]} : vector<4x128xf32> to vector<4x32xf32>
    %174 = vector.extract_strided_slice %172 {offsets = [0, 32], sizes = [4, 32], strides = [1, 1]} : vector<4x128xf32> to vector<4x32xf32>
    %175 = vector.extract_strided_slice %172 {offsets = [0, 64], sizes = [4, 32], strides = [1, 1]} : vector<4x128xf32> to vector<4x32xf32>
    %cst_71 = arith.constant 2.000000e+00 : f32
    %176 = vector.broadcast %cst_71 : f32 to vector<4x32xf32>
    %177 = arith.mulf %176, %175 : vector<4x32xf32>
    %cst_72 = arith.constant 1.000000e+00 : f32
    %178 = vector.broadcast %cst_72 : f32 to vector<4x32xf32>
    %179 = arith.subf %177, %178 : vector<4x32xf32>
    %180 = vector.extract_strided_slice %172 {offsets = [0, 96], sizes = [4, 32], strides = [1, 1]} : vector<4x128xf32> to vector<4x32xf32>
    %181 = arith.mulf %174, %161 : vector<4x32xf32>
    %182 = arith.mulf %173, %179 : vector<4x32xf32>
    %183 = arith.addf %181, %182 : vector<4x32xf32>
    %184 = math.tanh %183 : vector<4x32xf32>
    %185 = arith.mulf %180, %184 : vector<4x32xf32>
    %186 = vector.broadcast %c2_i32 : i32 to vector<4x1xi32>
    %187 = arith.cmpi sgt, %78, %186 : vector<4x1xi32>
    %cst_73 = arith.constant 0.000000e+00 : f32
    %188 = vector.shape_cast %187 : vector<4x1xi1> to vector<4x1xi1>
    %189 = vector.broadcast %188 : vector<4x1xi1> to vector<4x32xi1>
    %190 = vector.broadcast %cst_73 : f32 to vector<4x32xf32>
    %191 = arith.select %189, %185, %190 : vector<4x32xi1>, vector<4x32xf32>
    %192 = arith.index_cast %c2_i32 : i32 to index
    %c0_74 = arith.constant 0 : index
    %c0_75 = arith.constant 0 : index
    %193 = vector.load %arg8[%192, %c0_74, %c0_75] : memref<16x4x32xf32, #tpu.memory_space<vmem>>, vector<1x4x32xf32>
    %194 = vector.shape_cast %193 : vector<1x4x32xf32> to vector<4x32xf32>
    %195 = vector.shape_cast %191 : vector<4x32xf32> to vector<1x4x32xf32>
    tpu.vector_store %arg8[%192, %c0_74, %c0_75], %195 {strides = array<i32>} : memref<16x4x32xf32, #tpu.memory_space<vmem>>, vector<1x4x32xf32>,
    %196 = vector.shape_cast %187 : vector<4x1xi1> to vector<4x1xi1>
    %197 = vector.broadcast %196 : vector<4x1xi1> to vector<4x32xi1>
    %198 = arith.select %197, %185, %158 : vector<4x32xi1>, vector<4x32xf32>
    %199 = vector.shape_cast %187 : vector<4x1xi1> to vector<4x1xi1>
    %200 = vector.broadcast %199 : vector<4x1xi1> to vector<4x32xi1>
    %201 = arith.select %200, %183, %161 : vector<4x32xi1>, vector<4x32xf32>
    %c3_i32 = arith.constant 3 : i32
    %202 = arith.index_cast %c3_i32 : i32 to index
    %c0_76 = arith.constant 0 : index
    %c0_77 = arith.constant 0 : index
    %203 = vector.load %arg11[%202, %c0_76, %c0_77] : memref<16x4x128xf32, #tpu.memory_space<vmem>>, vector<1x4x128xf32>
    %204 = vector.shape_cast %203 : vector<1x4x128xf32> to vector<4x128xf32>
    %205 = arith.truncf %198 : vector<4x32xf32> to vector<4x32xbf16>
    %cst_78 = arith.constant dense<0.000000e+00> : vector<4x128xf32>
    %206 = tpu.matmul %205, %79, %cst_78 {dimension_numbers = #tpu.dot_dimension_numbers<[1], [0], [0], [1], [0, 0, 1, 1], [], []>} : vector<4x32xbf16>, vector<32x128xbf16>, vector<4x128xf32> -> vector<4x128xf32>
    %207 = arith.addf %204, %206 : vector<4x128xf32>
    %208 = arith.negf %207 : vector<4x128xf32>
    %209 = math.exp %208 : vector<4x128xf32>
    %cst_79 = arith.constant 1.000000e+00 : f32
    %210 = vector.broadcast %cst_79 : f32 to vector<4x128xf32>
    %211 = arith.addf %210, %209 : vector<4x128xf32>
    %212 = arith.divf %210, %211 : vector<4x128xf32>
    %213 = vector.extract_strided_slice %212 {offsets = [0, 0], sizes = [4, 32], strides = [1, 1]} : vector<4x128xf32> to vector<4x32xf32>
    %214 = vector.extract_strided_slice %212 {offsets = [0, 32], sizes = [4, 32], strides = [1, 1]} : vector<4x128xf32> to vector<4x32xf32>
    %215 = vector.extract_strided_slice %212 {offsets = [0, 64], sizes = [4, 32], strides = [1, 1]} : vector<4x128xf32> to vector<4x32xf32>
    %cst_80 = arith.constant 2.000000e+00 : f32
    %216 = vector.broadcast %cst_80 : f32 to vector<4x32xf32>
    %217 = arith.mulf %216, %215 : vector<4x32xf32>
    %cst_81 = arith.constant 1.000000e+00 : f32
    %218 = vector.broadcast %cst_81 : f32 to vector<4x32xf32>
    %219 = arith.subf %217, %218 : vector<4x32xf32>
    %220 = vector.extract_strided_slice %212 {offsets = [0, 96], sizes = [4, 32], strides = [1, 1]} : vector<4x128xf32> to vector<4x32xf32>
    %221 = arith.mulf %214, %201 : vector<4x32xf32>
    %222 = arith.mulf %213, %219 : vector<4x32xf32>
    %223 = arith.addf %221, %222 : vector<4x32xf32>
    %224 = math.tanh %223 : vector<4x32xf32>
    %225 = arith.mulf %220, %224 : vector<4x32xf32>
    %226 = vector.broadcast %c3_i32 : i32 to vector<4x1xi32>
    %227 = arith.cmpi sgt, %78, %226 : vector<4x1xi32>
    %cst_82 = arith.constant 0.000000e+00 : f32
    %228 = vector.shape_cast %227 : vector<4x1xi1> to vector<4x1xi1>
    %229 = vector.broadcast %228 : vector<4x1xi1> to vector<4x32xi1>
    %230 = vector.broadcast %cst_82 : f32 to vector<4x32xf32>
    %231 = arith.select %229, %225, %230 : vector<4x32xi1>, vector<4x32xf32>
    %232 = arith.index_cast %c3_i32 : i32 to index
    %c0_83 = arith.constant 0 : index
    %c0_84 = arith.constant 0 : index
    %233 = vector.load %arg8[%232, %c0_83, %c0_84] : memref<16x4x32xf32, #tpu.memory_space<vmem>>, vector<1x4x32xf32>
    %234 = vector.shape_cast %233 : vector<1x4x32xf32> to vector<4x32xf32>
    %235 = vector.shape_cast %231 : vector<4x32xf32> to vector<1x4x32xf32>
    tpu.vector_store %arg8[%232, %c0_83, %c0_84], %235 {strides = array<i32>} : memref<16x4x32xf32, #tpu.memory_space<vmem>>, vector<1x4x32xf32>,
    %236 = vector.shape_cast %227 : vector<4x1xi1> to vector<4x1xi1>
    %237 = vector.broadcast %236 : vector<4x1xi1> to vector<4x32xi1>
    %238 = arith.select %237, %225, %198 : vector<4x32xi1>, vector<4x32xf32>
    %239 = vector.shape_cast %227 : vector<4x1xi1> to vector<4x1xi1>
    %240 = vector.broadcast %239 : vector<4x1xi1> to vector<4x32xi1>
    %241 = arith.select %240, %223, %201 : vector<4x32xi1>, vector<4x32xf32>
    %c4_i32 = arith.constant 4 : i32
    %242 = arith.index_cast %c4_i32 : i32 to index
    %c0_85 = arith.constant 0 : index
    %c0_86 = arith.constant 0 : index
    %243 = vector.load %arg11[%242, %c0_85, %c0_86] : memref<16x4x128xf32, #tpu.memory_space<vmem>>, vector<1x4x128xf32>
    %244 = vector.shape_cast %243 : vector<1x4x128xf32> to vector<4x128xf32>
    %245 = arith.truncf %238 : vector<4x32xf32> to vector<4x32xbf16>
    %cst_87 = arith.constant dense<0.000000e+00> : vector<4x128xf32>
    %246 = tpu.matmul %245, %79, %cst_87 {dimension_numbers = #tpu.dot_dimension_numbers<[1], [0], [0], [1], [0, 0, 1, 1], [], []>} : vector<4x32xbf16>, vector<32x128xbf16>, vector<4x128xf32> -> vector<4x128xf32>
    %247 = arith.addf %244, %246 : vector<4x128xf32>
    %248 = arith.negf %247 : vector<4x128xf32>
    %249 = math.exp %248 : vector<4x128xf32>
    %cst_88 = arith.constant 1.000000e+00 : f32
    %250 = vector.broadcast %cst_88 : f32 to vector<4x128xf32>
    %251 = arith.addf %250, %249 : vector<4x128xf32>
    %252 = arith.divf %250, %251 : vector<4x128xf32>
    %253 = vector.extract_strided_slice %252 {offsets = [0, 0], sizes = [4, 32], strides = [1, 1]} : vector<4x128xf32> to vector<4x32xf32>
    %254 = vector.extract_strided_slice %252 {offsets = [0, 32], sizes = [4, 32], strides = [1, 1]} : vector<4x128xf32> to vector<4x32xf32>
    %255 = vector.extract_strided_slice %252 {offsets = [0, 64], sizes = [4, 32], strides = [1, 1]} : vector<4x128xf32> to vector<4x32xf32>
    %cst_89 = arith.constant 2.000000e+00 : f32
    %256 = vector.broadcast %cst_89 : f32 to vector<4x32xf32>
    %257 = arith.mulf %256, %255 : vector<4x32xf32>
    %cst_90 = arith.constant 1.000000e+00 : f32
    %258 = vector.broadcast %cst_90 : f32 to vector<4x32xf32>
    %259 = arith.subf %257, %258 : vector<4x32xf32>
    %260 = vector.extract_strided_slice %252 {offsets = [0, 96], sizes = [4, 32], strides = [1, 1]} : vector<4x128xf32> to vector<4x32xf32>
    %261 = arith.mulf %254, %241 : vector<4x32xf32>
    %262 = arith.mulf %253, %259 : vector<4x32xf32>
    %263 = arith.addf %261, %262 : vector<4x32xf32>
    %264 = math.tanh %263 : vector<4x32xf32>
    %265 = arith.mulf %260, %264 : vector<4x32xf32>
    %266 = vector.broadcast %c4_i32 : i32 to vector<4x1xi32>
    %267 = arith.cmpi sgt, %78, %266 : vector<4x1xi32>
    %cst_91 = arith.constant 0.000000e+00 : f32
    %268 = vector.shape_cast %267 : vector<4x1xi1> to vector<4x1xi1>
    %269 = vector.broadcast %268 : vector<4x1xi1> to vector<4x32xi1>
    %270 = vector.broadcast %cst_91 : f32 to vector<4x32xf32>
    %271 = arith.select %269, %265, %270 : vector<4x32xi1>, vector<4x32xf32>
    %272 = arith.index_cast %c4_i32 : i32 to index
    %c0_92 = arith.constant 0 : index
    %c0_93 = arith.constant 0 : index
    %273 = vector.load %arg8[%272, %c0_92, %c0_93] : memref<16x4x32xf32, #tpu.memory_space<vmem>>, vector<1x4x32xf32>
    %274 = vector.shape_cast %273 : vector<1x4x32xf32> to vector<4x32xf32>
    %275 = vector.shape_cast %271 : vector<4x32xf32> to vector<1x4x32xf32>
    tpu.vector_store %arg8[%272, %c0_92, %c0_93], %275 {strides = array<i32>} : memref<16x4x32xf32, #tpu.memory_space<vmem>>, vector<1x4x32xf32>,
    %276 = vector.shape_cast %267 : vector<4x1xi1> to vector<4x1xi1>
    %277 = vector.broadcast %276 : vector<4x1xi1> to vector<4x32xi1>
    %278 = arith.select %277, %265, %238 : vector<4x32xi1>, vector<4x32xf32>
    %279 = vector.shape_cast %267 : vector<4x1xi1> to vector<4x1xi1>
    %280 = vector.broadcast %279 : vector<4x1xi1> to vector<4x32xi1>
    %281 = arith.select %280, %263, %241 : vector<4x32xi1>, vector<4x32xf32>
    %c5_i32 = arith.constant 5 : i32
    %282 = arith.index_cast %c5_i32 : i32 to index
    %c0_94 = arith.constant 0 : index
    %c0_95 = arith.constant 0 : index
    %283 = vector.load %arg11[%282, %c0_94, %c0_95] : memref<16x4x128xf32, #tpu.memory_space<vmem>>, vector<1x4x128xf32>
    %284 = vector.shape_cast %283 : vector<1x4x128xf32> to vector<4x128xf32>
    %285 = arith.truncf %278 : vector<4x32xf32> to vector<4x32xbf16>
    %cst_96 = arith.constant dense<0.000000e+00> : vector<4x128xf32>
    %286 = tpu.matmul %285, %79, %cst_96 {dimension_numbers = #tpu.dot_dimension_numbers<[1], [0], [0], [1], [0, 0, 1, 1], [], []>} : vector<4x32xbf16>, vector<32x128xbf16>, vector<4x128xf32> -> vector<4x128xf32>
    %287 = arith.addf %284, %286 : vector<4x128xf32>
    %288 = arith.negf %287 : vector<4x128xf32>
    %289 = math.exp %288 : vector<4x128xf32>
    %cst_97 = arith.constant 1.000000e+00 : f32
    %290 = vector.broadcast %cst_97 : f32 to vector<4x128xf32>
    %291 = arith.addf %290, %289 : vector<4x128xf32>
    %292 = arith.divf %290, %291 : vector<4x128xf32>
    %293 = vector.extract_strided_slice %292 {offsets = [0, 0], sizes = [4, 32], strides = [1, 1]} : vector<4x128xf32> to vector<4x32xf32>
    %294 = vector.extract_strided_slice %292 {offsets = [0, 32], sizes = [4, 32], strides = [1, 1]} : vector<4x128xf32> to vector<4x32xf32>
    %295 = vector.extract_strided_slice %292 {offsets = [0, 64], sizes = [4, 32], strides = [1, 1]} : vector<4x128xf32> to vector<4x32xf32>
    %cst_98 = arith.constant 2.000000e+00 : f32
    %296 = vector.broadcast %cst_98 : f32 to vector<4x32xf32>
    %297 = arith.mulf %296, %295 : vector<4x32xf32>
    %cst_99 = arith.constant 1.000000e+00 : f32
    %298 = vector.broadcast %cst_99 : f32 to vector<4x32xf32>
    %299 = arith.subf %297, %298 : vector<4x32xf32>
    %300 = vector.extract_strided_slice %292 {offsets = [0, 96], sizes = [4, 32], strides = [1, 1]} : vector<4x128xf32> to vector<4x32xf32>
    %301 = arith.mulf %294, %281 : vector<4x32xf32>
    %302 = arith.mulf %293, %299 : vector<4x32xf32>
    %303 = arith.addf %301, %302 : vector<4x32xf32>
    %304 = math.tanh %303 : vector<4x32xf32>
    %305 = arith.mulf %300, %304 : vector<4x32xf32>
    %306 = vector.broadcast %c5_i32 : i32 to vector<4x1xi32>
    %307 = arith.cmpi sgt, %78, %306 : vector<4x1xi32>
    %cst_100 = arith.constant 0.000000e+00 : f32
    %308 = vector.shape_cast %307 : vector<4x1xi1> to vector<4x1xi1>
    %309 = vector.broadcast %308 : vector<4x1xi1> to vector<4x32xi1>
    %310 = vector.broadcast %cst_100 : f32 to vector<4x32xf32>
    %311 = arith.select %309, %305, %310 : vector<4x32xi1>, vector<4x32xf32>
    %312 = arith.index_cast %c5_i32 : i32 to index
    %c0_101 = arith.constant 0 : index
    %c0_102 = arith.constant 0 : index
    %313 = vector.load %arg8[%312, %c0_101, %c0_102] : memref<16x4x32xf32, #tpu.memory_space<vmem>>, vector<1x4x32xf32>
    %314 = vector.shape_cast %313 : vector<1x4x32xf32> to vector<4x32xf32>
    %315 = vector.shape_cast %311 : vector<4x32xf32> to vector<1x4x32xf32>
    tpu.vector_store %arg8[%312, %c0_101, %c0_102], %315 {strides = array<i32>} : memref<16x4x32xf32, #tpu.memory_space<vmem>>, vector<1x4x32xf32>,
    %316 = vector.shape_cast %307 : vector<4x1xi1> to vector<4x1xi1>
    %317 = vector.broadcast %316 : vector<4x1xi1> to vector<4x32xi1>
    %318 = arith.select %317, %305, %278 : vector<4x32xi1>, vector<4x32xf32>
    %319 = vector.shape_cast %307 : vector<4x1xi1> to vector<4x1xi1>
    %320 = vector.broadcast %319 : vector<4x1xi1> to vector<4x32xi1>
    %321 = arith.select %320, %303, %281 : vector<4x32xi1>, vector<4x32xf32>
    %c6_i32 = arith.constant 6 : i32
    %322 = arith.index_cast %c6_i32 : i32 to index
    %c0_103 = arith.constant 0 : index
    %c0_104 = arith.constant 0 : index
    %323 = vector.load %arg11[%322, %c0_103, %c0_104] : memref<16x4x128xf32, #tpu.memory_space<vmem>>, vector<1x4x128xf32>
    %324 = vector.shape_cast %323 : vector<1x4x128xf32> to vector<4x128xf32>
    %325 = arith.truncf %318 : vector<4x32xf32> to vector<4x32xbf16>
    %cst_105 = arith.constant dense<0.000000e+00> : vector<4x128xf32>
    %326 = tpu.matmul %325, %79, %cst_105 {dimension_numbers = #tpu.dot_dimension_numbers<[1], [0], [0], [1], [0, 0, 1, 1], [], []>} : vector<4x32xbf16>, vector<32x128xbf16>, vector<4x128xf32> -> vector<4x128xf32>
    %327 = arith.addf %324, %326 : vector<4x128xf32>
    %328 = arith.negf %327 : vector<4x128xf32>
    %329 = math.exp %328 : vector<4x128xf32>
    %cst_106 = arith.constant 1.000000e+00 : f32
    %330 = vector.broadcast %cst_106 : f32 to vector<4x128xf32>
    %331 = arith.addf %330, %329 : vector<4x128xf32>
    %332 = arith.divf %330, %331 : vector<4x128xf32>
    %333 = vector.extract_strided_slice %332 {offsets = [0, 0], sizes = [4, 32], strides = [1, 1]} : vector<4x128xf32> to vector<4x32xf32>
    %334 = vector.extract_strided_slice %332 {offsets = [0, 32], sizes = [4, 32], strides = [1, 1]} : vector<4x128xf32> to vector<4x32xf32>
    %335 = vector.extract_strided_slice %332 {offsets = [0, 64], sizes = [4, 32], strides = [1, 1]} : vector<4x128xf32> to vector<4x32xf32>
    %cst_107 = arith.constant 2.000000e+00 : f32
    %336 = vector.broadcast %cst_107 : f32 to vector<4x32xf32>
    %337 = arith.mulf %336, %335 : vector<4x32xf32>
    %cst_108 = arith.constant 1.000000e+00 : f32
    %338 = vector.broadcast %cst_108 : f32 to vector<4x32xf32>
    %339 = arith.subf %337, %338 : vector<4x32xf32>
    %340 = vector.extract_strided_slice %332 {offsets = [0, 96], sizes = [4, 32], strides = [1, 1]} : vector<4x128xf32> to vector<4x32xf32>
    %341 = arith.mulf %334, %321 : vector<4x32xf32>
    %342 = arith.mulf %333, %339 : vector<4x32xf32>
    %343 = arith.addf %341, %342 : vector<4x32xf32>
    %344 = math.tanh %343 : vector<4x32xf32>
    %345 = arith.mulf %340, %344 : vector<4x32xf32>
    %346 = vector.broadcast %c6_i32 : i32 to vector<4x1xi32>
    %347 = arith.cmpi sgt, %78, %346 : vector<4x1xi32>
    %cst_109 = arith.constant 0.000000e+00 : f32
    %348 = vector.shape_cast %347 : vector<4x1xi1> to vector<4x1xi1>
    %349 = vector.broadcast %348 : vector<4x1xi1> to vector<4x32xi1>
    %350 = vector.broadcast %cst_109 : f32 to vector<4x32xf32>
    %351 = arith.select %349, %345, %350 : vector<4x32xi1>, vector<4x32xf32>
    %352 = arith.index_cast %c6_i32 : i32 to index
    %c0_110 = arith.constant 0 : index
    %c0_111 = arith.constant 0 : index
    %353 = vector.load %arg8[%352, %c0_110, %c0_111] : memref<16x4x32xf32, #tpu.memory_space<vmem>>, vector<1x4x32xf32>
    %354 = vector.shape_cast %353 : vector<1x4x32xf32> to vector<4x32xf32>
    %355 = vector.shape_cast %351 : vector<4x32xf32> to vector<1x4x32xf32>
    tpu.vector_store %arg8[%352, %c0_110, %c0_111], %355 {strides = array<i32>} : memref<16x4x32xf32, #tpu.memory_space<vmem>>, vector<1x4x32xf32>,
    %356 = vector.shape_cast %347 : vector<4x1xi1> to vector<4x1xi1>
    %357 = vector.broadcast %356 : vector<4x1xi1> to vector<4x32xi1>
    %358 = arith.select %357, %345, %318 : vector<4x32xi1>, vector<4x32xf32>
    %359 = vector.shape_cast %347 : vector<4x1xi1> to vector<4x1xi1>
    %360 = vector.broadcast %359 : vector<4x1xi1> to vector<4x32xi1>
    %361 = arith.select %360, %343, %321 : vector<4x32xi1>, vector<4x32xf32>
    %c7_i32 = arith.constant 7 : i32
    %362 = arith.index_cast %c7_i32 : i32 to index
    %c0_112 = arith.constant 0 : index
    %c0_113 = arith.constant 0 : index
    %363 = vector.load %arg11[%362, %c0_112, %c0_113] : memref<16x4x128xf32, #tpu.memory_space<vmem>>, vector<1x4x128xf32>
    %364 = vector.shape_cast %363 : vector<1x4x128xf32> to vector<4x128xf32>
    %365 = arith.truncf %358 : vector<4x32xf32> to vector<4x32xbf16>
    %cst_114 = arith.constant dense<0.000000e+00> : vector<4x128xf32>
    %366 = tpu.matmul %365, %79, %cst_114 {dimension_numbers = #tpu.dot_dimension_numbers<[1], [0], [0], [1], [0, 0, 1, 1], [], []>} : vector<4x32xbf16>, vector<32x128xbf16>, vector<4x128xf32> -> vector<4x128xf32>
    %367 = arith.addf %364, %366 : vector<4x128xf32>
    %368 = arith.negf %367 : vector<4x128xf32>
    %369 = math.exp %368 : vector<4x128xf32>
    %cst_115 = arith.constant 1.000000e+00 : f32
    %370 = vector.broadcast %cst_115 : f32 to vector<4x128xf32>
    %371 = arith.addf %370, %369 : vector<4x128xf32>
    %372 = arith.divf %370, %371 : vector<4x128xf32>
    %373 = vector.extract_strided_slice %372 {offsets = [0, 0], sizes = [4, 32], strides = [1, 1]} : vector<4x128xf32> to vector<4x32xf32>
    %374 = vector.extract_strided_slice %372 {offsets = [0, 32], sizes = [4, 32], strides = [1, 1]} : vector<4x128xf32> to vector<4x32xf32>
    %375 = vector.extract_strided_slice %372 {offsets = [0, 64], sizes = [4, 32], strides = [1, 1]} : vector<4x128xf32> to vector<4x32xf32>
    %cst_116 = arith.constant 2.000000e+00 : f32
    %376 = vector.broadcast %cst_116 : f32 to vector<4x32xf32>
    %377 = arith.mulf %376, %375 : vector<4x32xf32>
    %cst_117 = arith.constant 1.000000e+00 : f32
    %378 = vector.broadcast %cst_117 : f32 to vector<4x32xf32>
    %379 = arith.subf %377, %378 : vector<4x32xf32>
    %380 = vector.extract_strided_slice %372 {offsets = [0, 96], sizes = [4, 32], strides = [1, 1]} : vector<4x128xf32> to vector<4x32xf32>
    %381 = arith.mulf %374, %361 : vector<4x32xf32>
    %382 = arith.mulf %373, %379 : vector<4x32xf32>
    %383 = arith.addf %381, %382 : vector<4x32xf32>
    %384 = math.tanh %383 : vector<4x32xf32>
    %385 = arith.mulf %380, %384 : vector<4x32xf32>
    %386 = vector.broadcast %c7_i32 : i32 to vector<4x1xi32>
    %387 = arith.cmpi sgt, %78, %386 : vector<4x1xi32>
    %cst_118 = arith.constant 0.000000e+00 : f32
    %388 = vector.shape_cast %387 : vector<4x1xi1> to vector<4x1xi1>
    %389 = vector.broadcast %388 : vector<4x1xi1> to vector<4x32xi1>
    %390 = vector.broadcast %cst_118 : f32 to vector<4x32xf32>
    %391 = arith.select %389, %385, %390 : vector<4x32xi1>, vector<4x32xf32>
    %392 = arith.index_cast %c7_i32 : i32 to index
    %c0_119 = arith.constant 0 : index
    %c0_120 = arith.constant 0 : index
    %393 = vector.load %arg8[%392, %c0_119, %c0_120] : memref<16x4x32xf32, #tpu.memory_space<vmem>>, vector<1x4x32xf32>
    %394 = vector.shape_cast %393 : vector<1x4x32xf32> to vector<4x32xf32>
    %395 = vector.shape_cast %391 : vector<4x32xf32> to vector<1x4x32xf32>
    tpu.vector_store %arg8[%392, %c0_119, %c0_120], %395 {strides = array<i32>} : memref<16x4x32xf32, #tpu.memory_space<vmem>>, vector<1x4x32xf32>,
    %396 = vector.shape_cast %387 : vector<4x1xi1> to vector<4x1xi1>
    %397 = vector.broadcast %396 : vector<4x1xi1> to vector<4x32xi1>
    %398 = arith.select %397, %385, %358 : vector<4x32xi1>, vector<4x32xf32>
    %399 = vector.shape_cast %387 : vector<4x1xi1> to vector<4x1xi1>
    %400 = vector.broadcast %399 : vector<4x1xi1> to vector<4x32xi1>
    %401 = arith.select %400, %383, %361 : vector<4x32xi1>, vector<4x32xf32>
    %c8_i32 = arith.constant 8 : i32
    %402 = arith.index_cast %c8_i32 : i32 to index
    %c0_121 = arith.constant 0 : index
    %c0_122 = arith.constant 0 : index
    %403 = vector.load %arg11[%402, %c0_121, %c0_122] : memref<16x4x128xf32, #tpu.memory_space<vmem>>, vector<1x4x128xf32>
    %404 = vector.shape_cast %403 : vector<1x4x128xf32> to vector<4x128xf32>
    %405 = arith.truncf %398 : vector<4x32xf32> to vector<4x32xbf16>
    %cst_123 = arith.constant dense<0.000000e+00> : vector<4x128xf32>
    %406 = tpu.matmul %405, %79, %cst_123 {dimension_numbers = #tpu.dot_dimension_numbers<[1], [0], [0], [1], [0, 0, 1, 1], [], []>} : vector<4x32xbf16>, vector<32x128xbf16>, vector<4x128xf32> -> vector<4x128xf32>
    %407 = arith.addf %404, %406 : vector<4x128xf32>
    %408 = arith.negf %407 : vector<4x128xf32>
    %409 = math.exp %408 : vector<4x128xf32>
    %cst_124 = arith.constant 1.000000e+00 : f32
    %410 = vector.broadcast %cst_124 : f32 to vector<4x128xf32>
    %411 = arith.addf %410, %409 : vector<4x128xf32>
    %412 = arith.divf %410, %411 : vector<4x128xf32>
    %413 = vector.extract_strided_slice %412 {offsets = [0, 0], sizes = [4, 32], strides = [1, 1]} : vector<4x128xf32> to vector<4x32xf32>
    %414 = vector.extract_strided_slice %412 {offsets = [0, 32], sizes = [4, 32], strides = [1, 1]} : vector<4x128xf32> to vector<4x32xf32>
    %415 = vector.extract_strided_slice %412 {offsets = [0, 64], sizes = [4, 32], strides = [1, 1]} : vector<4x128xf32> to vector<4x32xf32>
    %cst_125 = arith.constant 2.000000e+00 : f32
    %416 = vector.broadcast %cst_125 : f32 to vector<4x32xf32>
    %417 = arith.mulf %416, %415 : vector<4x32xf32>
    %cst_126 = arith.constant 1.000000e+00 : f32
    %418 = vector.broadcast %cst_126 : f32 to vector<4x32xf32>
    %419 = arith.subf %417, %418 : vector<4x32xf32>
    %420 = vector.extract_strided_slice %412 {offsets = [0, 96], sizes = [4, 32], strides = [1, 1]} : vector<4x128xf32> to vector<4x32xf32>
    %421 = arith.mulf %414, %401 : vector<4x32xf32>
    %422 = arith.mulf %413, %419 : vector<4x32xf32>
    %423 = arith.addf %421, %422 : vector<4x32xf32>
    %424 = math.tanh %423 : vector<4x32xf32>
    %425 = arith.mulf %420, %424 : vector<4x32xf32>
    %426 = vector.broadcast %c8_i32 : i32 to vector<4x1xi32>
    %427 = arith.cmpi sgt, %78, %426 : vector<4x1xi32>
    %cst_127 = arith.constant 0.000000e+00 : f32
    %428 = vector.shape_cast %427 : vector<4x1xi1> to vector<4x1xi1>
    %429 = vector.broadcast %428 : vector<4x1xi1> to vector<4x32xi1>
    %430 = vector.broadcast %cst_127 : f32 to vector<4x32xf32>
    %431 = arith.select %429, %425, %430 : vector<4x32xi1>, vector<4x32xf32>
    %432 = arith.index_cast %c8_i32 : i32 to index
    %c0_128 = arith.constant 0 : index
    %c0_129 = arith.constant 0 : index
    %433 = vector.load %arg8[%432, %c0_128, %c0_129] : memref<16x4x32xf32, #tpu.memory_space<vmem>>, vector<1x4x32xf32>
    %434 = vector.shape_cast %433 : vector<1x4x32xf32> to vector<4x32xf32>
    %435 = vector.shape_cast %431 : vector<4x32xf32> to vector<1x4x32xf32>
    tpu.vector_store %arg8[%432, %c0_128, %c0_129], %435 {strides = array<i32>} : memref<16x4x32xf32, #tpu.memory_space<vmem>>, vector<1x4x32xf32>,
    %436 = vector.shape_cast %427 : vector<4x1xi1> to vector<4x1xi1>
    %437 = vector.broadcast %436 : vector<4x1xi1> to vector<4x32xi1>
    %438 = arith.select %437, %425, %398 : vector<4x32xi1>, vector<4x32xf32>
    %439 = vector.shape_cast %427 : vector<4x1xi1> to vector<4x1xi1>
    %440 = vector.broadcast %439 : vector<4x1xi1> to vector<4x32xi1>
    %441 = arith.select %440, %423, %401 : vector<4x32xi1>, vector<4x32xf32>
    %c9_i32 = arith.constant 9 : i32
    %442 = arith.index_cast %c9_i32 : i32 to index
    %c0_130 = arith.constant 0 : index
    %c0_131 = arith.constant 0 : index
    %443 = vector.load %arg11[%442, %c0_130, %c0_131] : memref<16x4x128xf32, #tpu.memory_space<vmem>>, vector<1x4x128xf32>
    %444 = vector.shape_cast %443 : vector<1x4x128xf32> to vector<4x128xf32>
    %445 = arith.truncf %438 : vector<4x32xf32> to vector<4x32xbf16>
    %cst_132 = arith.constant dense<0.000000e+00> : vector<4x128xf32>
    %446 = tpu.matmul %445, %79, %cst_132 {dimension_numbers = #tpu.dot_dimension_numbers<[1], [0], [0], [1], [0, 0, 1, 1], [], []>} : vector<4x32xbf16>, vector<32x128xbf16>, vector<4x128xf32> -> vector<4x128xf32>
    %447 = arith.addf %444, %446 : vector<4x128xf32>
    %448 = arith.negf %447 : vector<4x128xf32>
    %449 = math.exp %448 : vector<4x128xf32>
    %cst_133 = arith.constant 1.000000e+00 : f32
    %450 = vector.broadcast %cst_133 : f32 to vector<4x128xf32>
    %451 = arith.addf %450, %449 : vector<4x128xf32>
    %452 = arith.divf %450, %451 : vector<4x128xf32>
    %453 = vector.extract_strided_slice %452 {offsets = [0, 0], sizes = [4, 32], strides = [1, 1]} : vector<4x128xf32> to vector<4x32xf32>
    %454 = vector.extract_strided_slice %452 {offsets = [0, 32], sizes = [4, 32], strides = [1, 1]} : vector<4x128xf32> to vector<4x32xf32>
    %455 = vector.extract_strided_slice %452 {offsets = [0, 64], sizes = [4, 32], strides = [1, 1]} : vector<4x128xf32> to vector<4x32xf32>
    %cst_134 = arith.constant 2.000000e+00 : f32
    %456 = vector.broadcast %cst_134 : f32 to vector<4x32xf32>
    %457 = arith.mulf %456, %455 : vector<4x32xf32>
    %cst_135 = arith.constant 1.000000e+00 : f32
    %458 = vector.broadcast %cst_135 : f32 to vector<4x32xf32>
    %459 = arith.subf %457, %458 : vector<4x32xf32>
    %460 = vector.extract_strided_slice %452 {offsets = [0, 96], sizes = [4, 32], strides = [1, 1]} : vector<4x128xf32> to vector<4x32xf32>
    %461 = arith.mulf %454, %441 : vector<4x32xf32>
    %462 = arith.mulf %453, %459 : vector<4x32xf32>
    %463 = arith.addf %461, %462 : vector<4x32xf32>
    %464 = math.tanh %463 : vector<4x32xf32>
    %465 = arith.mulf %460, %464 : vector<4x32xf32>
    %466 = vector.broadcast %c9_i32 : i32 to vector<4x1xi32>
    %467 = arith.cmpi sgt, %78, %466 : vector<4x1xi32>
    %cst_136 = arith.constant 0.000000e+00 : f32
    %468 = vector.shape_cast %467 : vector<4x1xi1> to vector<4x1xi1>
    %469 = vector.broadcast %468 : vector<4x1xi1> to vector<4x32xi1>
    %470 = vector.broadcast %cst_136 : f32 to vector<4x32xf32>
    %471 = arith.select %469, %465, %470 : vector<4x32xi1>, vector<4x32xf32>
    %472 = arith.index_cast %c9_i32 : i32 to index
    %c0_137 = arith.constant 0 : index
    %c0_138 = arith.constant 0 : index
    %473 = vector.load %arg8[%472, %c0_137, %c0_138] : memref<16x4x32xf32, #tpu.memory_space<vmem>>, vector<1x4x32xf32>
    %474 = vector.shape_cast %473 : vector<1x4x32xf32> to vector<4x32xf32>
    %475 = vector.shape_cast %471 : vector<4x32xf32> to vector<1x4x32xf32>
    tpu.vector_store %arg8[%472, %c0_137, %c0_138], %475 {strides = array<i32>} : memref<16x4x32xf32, #tpu.memory_space<vmem>>, vector<1x4x32xf32>,
    %476 = vector.shape_cast %467 : vector<4x1xi1> to vector<4x1xi1>
    %477 = vector.broadcast %476 : vector<4x1xi1> to vector<4x32xi1>
    %478 = arith.select %477, %465, %438 : vector<4x32xi1>, vector<4x32xf32>
    %479 = vector.shape_cast %467 : vector<4x1xi1> to vector<4x1xi1>
    %480 = vector.broadcast %479 : vector<4x1xi1> to vector<4x32xi1>
    %481 = arith.select %480, %463, %441 : vector<4x32xi1>, vector<4x32xf32>
    %c10_i32 = arith.constant 10 : i32
    %482 = arith.index_cast %c10_i32 : i32 to index
    %c0_139 = arith.constant 0 : index
    %c0_140 = arith.constant 0 : index
    %483 = vector.load %arg11[%482, %c0_139, %c0_140] : memref<16x4x128xf32, #tpu.memory_space<vmem>>, vector<1x4x128xf32>
    %484 = vector.shape_cast %483 : vector<1x4x128xf32> to vector<4x128xf32>
    %485 = arith.truncf %478 : vector<4x32xf32> to vector<4x32xbf16>
    %cst_141 = arith.constant dense<0.000000e+00> : vector<4x128xf32>
    %486 = tpu.matmul %485, %79, %cst_141 {dimension_numbers = #tpu.dot_dimension_numbers<[1], [0], [0], [1], [0, 0, 1, 1], [], []>} : vector<4x32xbf16>, vector<32x128xbf16>, vector<4x128xf32> -> vector<4x128xf32>
    %487 = arith.addf %484, %486 : vector<4x128xf32>
    %488 = arith.negf %487 : vector<4x128xf32>
    %489 = math.exp %488 : vector<4x128xf32>
    %cst_142 = arith.constant 1.000000e+00 : f32
    %490 = vector.broadcast %cst_142 : f32 to vector<4x128xf32>
    %491 = arith.addf %490, %489 : vector<4x128xf32>
    %492 = arith.divf %490, %491 : vector<4x128xf32>
    %493 = vector.extract_strided_slice %492 {offsets = [0, 0], sizes = [4, 32], strides = [1, 1]} : vector<4x128xf32> to vector<4x32xf32>
    %494 = vector.extract_strided_slice %492 {offsets = [0, 32], sizes = [4, 32], strides = [1, 1]} : vector<4x128xf32> to vector<4x32xf32>
    %495 = vector.extract_strided_slice %492 {offsets = [0, 64], sizes = [4, 32], strides = [1, 1]} : vector<4x128xf32> to vector<4x32xf32>
    %cst_143 = arith.constant 2.000000e+00 : f32
    %496 = vector.broadcast %cst_143 : f32 to vector<4x32xf32>
    %497 = arith.mulf %496, %495 : vector<4x32xf32>
    %cst_144 = arith.constant 1.000000e+00 : f32
    %498 = vector.broadcast %cst_144 : f32 to vector<4x32xf32>
    %499 = arith.subf %497, %498 : vector<4x32xf32>
    %500 = vector.extract_strided_slice %492 {offsets = [0, 96], sizes = [4, 32], strides = [1, 1]} : vector<4x128xf32> to vector<4x32xf32>
    %501 = arith.mulf %494, %481 : vector<4x32xf32>
    %502 = arith.mulf %493, %499 : vector<4x32xf32>
    %503 = arith.addf %501, %502 : vector<4x32xf32>
    %504 = math.tanh %503 : vector<4x32xf32>
    %505 = arith.mulf %500, %504 : vector<4x32xf32>
    %506 = vector.broadcast %c10_i32 : i32 to vector<4x1xi32>
    %507 = arith.cmpi sgt, %78, %506 : vector<4x1xi32>
    %cst_145 = arith.constant 0.000000e+00 : f32
    %508 = vector.shape_cast %507 : vector<4x1xi1> to vector<4x1xi1>
    %509 = vector.broadcast %508 : vector<4x1xi1> to vector<4x32xi1>
    %510 = vector.broadcast %cst_145 : f32 to vector<4x32xf32>
    %511 = arith.select %509, %505, %510 : vector<4x32xi1>, vector<4x32xf32>
    %512 = arith.index_cast %c10_i32 : i32 to index
    %c0_146 = arith.constant 0 : index
    %c0_147 = arith.constant 0 : index
    %513 = vector.load %arg8[%512, %c0_146, %c0_147] : memref<16x4x32xf32, #tpu.memory_space<vmem>>, vector<1x4x32xf32>
    %514 = vector.shape_cast %513 : vector<1x4x32xf32> to vector<4x32xf32>
    %515 = vector.shape_cast %511 : vector<4x32xf32> to vector<1x4x32xf32>
    tpu.vector_store %arg8[%512, %c0_146, %c0_147], %515 {strides = array<i32>} : memref<16x4x32xf32, #tpu.memory_space<vmem>>, vector<1x4x32xf32>,
    %516 = vector.shape_cast %507 : vector<4x1xi1> to vector<4x1xi1>
    %517 = vector.broadcast %516 : vector<4x1xi1> to vector<4x32xi1>
    %518 = arith.select %517, %505, %478 : vector<4x32xi1>, vector<4x32xf32>
    %519 = vector.shape_cast %507 : vector<4x1xi1> to vector<4x1xi1>
    %520 = vector.broadcast %519 : vector<4x1xi1> to vector<4x32xi1>
    %521 = arith.select %520, %503, %481 : vector<4x32xi1>, vector<4x32xf32>
    %c11_i32 = arith.constant 11 : i32
    %522 = arith.index_cast %c11_i32 : i32 to index
    %c0_148 = arith.constant 0 : index
    %c0_149 = arith.constant 0 : index
    %523 = vector.load %arg11[%522, %c0_148, %c0_149] : memref<16x4x128xf32, #tpu.memory_space<vmem>>, vector<1x4x128xf32>
    %524 = vector.shape_cast %523 : vector<1x4x128xf32> to vector<4x128xf32>
    %525 = arith.truncf %518 : vector<4x32xf32> to vector<4x32xbf16>
    %cst_150 = arith.constant dense<0.000000e+00> : vector<4x128xf32>
    %526 = tpu.matmul %525, %79, %cst_150 {dimension_numbers = #tpu.dot_dimension_numbers<[1], [0], [0], [1], [0, 0, 1, 1], [], []>} : vector<4x32xbf16>, vector<32x128xbf16>, vector<4x128xf32> -> vector<4x128xf32>
    %527 = arith.addf %524, %526 : vector<4x128xf32>
    %528 = arith.negf %527 : vector<4x128xf32>
    %529 = math.exp %528 : vector<4x128xf32>
    %cst_151 = arith.constant 1.000000e+00 : f32
    %530 = vector.broadcast %cst_151 : f32 to vector<4x128xf32>
    %531 = arith.addf %530, %529 : vector<4x128xf32>
    %532 = arith.divf %530, %531 : vector<4x128xf32>
    %533 = vector.extract_strided_slice %532 {offsets = [0, 0], sizes = [4, 32], strides = [1, 1]} : vector<4x128xf32> to vector<4x32xf32>
    %534 = vector.extract_strided_slice %532 {offsets = [0, 32], sizes = [4, 32], strides = [1, 1]} : vector<4x128xf32> to vector<4x32xf32>
    %535 = vector.extract_strided_slice %532 {offsets = [0, 64], sizes = [4, 32], strides = [1, 1]} : vector<4x128xf32> to vector<4x32xf32>
    %cst_152 = arith.constant 2.000000e+00 : f32
    %536 = vector.broadcast %cst_152 : f32 to vector<4x32xf32>
    %537 = arith.mulf %536, %535 : vector<4x32xf32>
    %cst_153 = arith.constant 1.000000e+00 : f32
    %538 = vector.broadcast %cst_153 : f32 to vector<4x32xf32>
    %539 = arith.subf %537, %538 : vector<4x32xf32>
    %540 = vector.extract_strided_slice %532 {offsets = [0, 96], sizes = [4, 32], strides = [1, 1]} : vector<4x128xf32> to vector<4x32xf32>
    %541 = arith.mulf %534, %521 : vector<4x32xf32>
    %542 = arith.mulf %533, %539 : vector<4x32xf32>
    %543 = arith.addf %541, %542 : vector<4x32xf32>
    %544 = math.tanh %543 : vector<4x32xf32>
    %545 = arith.mulf %540, %544 : vector<4x32xf32>
    %546 = vector.broadcast %c11_i32 : i32 to vector<4x1xi32>
    %547 = arith.cmpi sgt, %78, %546 : vector<4x1xi32>
    %cst_154 = arith.constant 0.000000e+00 : f32
    %548 = vector.shape_cast %547 : vector<4x1xi1> to vector<4x1xi1>
    %549 = vector.broadcast %548 : vector<4x1xi1> to vector<4x32xi1>
    %550 = vector.broadcast %cst_154 : f32 to vector<4x32xf32>
    %551 = arith.select %549, %545, %550 : vector<4x32xi1>, vector<4x32xf32>
    %552 = arith.index_cast %c11_i32 : i32 to index
    %c0_155 = arith.constant 0 : index
    %c0_156 = arith.constant 0 : index
    %553 = vector.load %arg8[%552, %c0_155, %c0_156] : memref<16x4x32xf32, #tpu.memory_space<vmem>>, vector<1x4x32xf32>
    %554 = vector.shape_cast %553 : vector<1x4x32xf32> to vector<4x32xf32>
    %555 = vector.shape_cast %551 : vector<4x32xf32> to vector<1x4x32xf32>
    tpu.vector_store %arg8[%552, %c0_155, %c0_156], %555 {strides = array<i32>} : memref<16x4x32xf32, #tpu.memory_space<vmem>>, vector<1x4x32xf32>,
    %556 = vector.shape_cast %547 : vector<4x1xi1> to vector<4x1xi1>
    %557 = vector.broadcast %556 : vector<4x1xi1> to vector<4x32xi1>
    %558 = arith.select %557, %545, %518 : vector<4x32xi1>, vector<4x32xf32>
    %559 = vector.shape_cast %547 : vector<4x1xi1> to vector<4x1xi1>
    %560 = vector.broadcast %559 : vector<4x1xi1> to vector<4x32xi1>
    %561 = arith.select %560, %543, %521 : vector<4x32xi1>, vector<4x32xf32>
    %c12_i32 = arith.constant 12 : i32
    %562 = arith.index_cast %c12_i32 : i32 to index
    %c0_157 = arith.constant 0 : index
    %c0_158 = arith.constant 0 : index
    %563 = vector.load %arg11[%562, %c0_157, %c0_158] : memref<16x4x128xf32, #tpu.memory_space<vmem>>, vector<1x4x128xf32>
    %564 = vector.shape_cast %563 : vector<1x4x128xf32> to vector<4x128xf32>
    %565 = arith.truncf %558 : vector<4x32xf32> to vector<4x32xbf16>
    %cst_159 = arith.constant dense<0.000000e+00> : vector<4x128xf32>
    %566 = tpu.matmul %565, %79, %cst_159 {dimension_numbers = #tpu.dot_dimension_numbers<[1], [0], [0], [1], [0, 0, 1, 1], [], []>} : vector<4x32xbf16>, vector<32x128xbf16>, vector<4x128xf32> -> vector<4x128xf32>
    %567 = arith.addf %564, %566 : vector<4x128xf32>
    %568 = arith.negf %567 : vector<4x128xf32>
    %569 = math.exp %568 : vector<4x128xf32>
    %cst_160 = arith.constant 1.000000e+00 : f32
    %570 = vector.broadcast %cst_160 : f32 to vector<4x128xf32>
    %571 = arith.addf %570, %569 : vector<4x128xf32>
    %572 = arith.divf %570, %571 : vector<4x128xf32>
    %573 = vector.extract_strided_slice %572 {offsets = [0, 0], sizes = [4, 32], strides = [1, 1]} : vector<4x128xf32> to vector<4x32xf32>
    %574 = vector.extract_strided_slice %572 {offsets = [0, 32], sizes = [4, 32], strides = [1, 1]} : vector<4x128xf32> to vector<4x32xf32>
    %575 = vector.extract_strided_slice %572 {offsets = [0, 64], sizes = [4, 32], strides = [1, 1]} : vector<4x128xf32> to vector<4x32xf32>
    %cst_161 = arith.constant 2.000000e+00 : f32
    %576 = vector.broadcast %cst_161 : f32 to vector<4x32xf32>
    %577 = arith.mulf %576, %575 : vector<4x32xf32>
    %cst_162 = arith.constant 1.000000e+00 : f32
    %578 = vector.broadcast %cst_162 : f32 to vector<4x32xf32>
    %579 = arith.subf %577, %578 : vector<4x32xf32>
    %580 = vector.extract_strided_slice %572 {offsets = [0, 96], sizes = [4, 32], strides = [1, 1]} : vector<4x128xf32> to vector<4x32xf32>
    %581 = arith.mulf %574, %561 : vector<4x32xf32>
    %582 = arith.mulf %573, %579 : vector<4x32xf32>
    %583 = arith.addf %581, %582 : vector<4x32xf32>
    %584 = math.tanh %583 : vector<4x32xf32>
    %585 = arith.mulf %580, %584 : vector<4x32xf32>
    %586 = vector.broadcast %c12_i32 : i32 to vector<4x1xi32>
    %587 = arith.cmpi sgt, %78, %586 : vector<4x1xi32>
    %cst_163 = arith.constant 0.000000e+00 : f32
    %588 = vector.shape_cast %587 : vector<4x1xi1> to vector<4x1xi1>
    %589 = vector.broadcast %588 : vector<4x1xi1> to vector<4x32xi1>
    %590 = vector.broadcast %cst_163 : f32 to vector<4x32xf32>
    %591 = arith.select %589, %585, %590 : vector<4x32xi1>, vector<4x32xf32>
    %592 = arith.index_cast %c12_i32 : i32 to index
    %c0_164 = arith.constant 0 : index
    %c0_165 = arith.constant 0 : index
    %593 = vector.load %arg8[%592, %c0_164, %c0_165] : memref<16x4x32xf32, #tpu.memory_space<vmem>>, vector<1x4x32xf32>
    %594 = vector.shape_cast %593 : vector<1x4x32xf32> to vector<4x32xf32>
    %595 = vector.shape_cast %591 : vector<4x32xf32> to vector<1x4x32xf32>
    tpu.vector_store %arg8[%592, %c0_164, %c0_165], %595 {strides = array<i32>} : memref<16x4x32xf32, #tpu.memory_space<vmem>>, vector<1x4x32xf32>,
    %596 = vector.shape_cast %587 : vector<4x1xi1> to vector<4x1xi1>
    %597 = vector.broadcast %596 : vector<4x1xi1> to vector<4x32xi1>
    %598 = arith.select %597, %585, %558 : vector<4x32xi1>, vector<4x32xf32>
    %599 = vector.shape_cast %587 : vector<4x1xi1> to vector<4x1xi1>
    %600 = vector.broadcast %599 : vector<4x1xi1> to vector<4x32xi1>
    %601 = arith.select %600, %583, %561 : vector<4x32xi1>, vector<4x32xf32>
    %c13_i32 = arith.constant 13 : i32
    %602 = arith.index_cast %c13_i32 : i32 to index
    %c0_166 = arith.constant 0 : index
    %c0_167 = arith.constant 0 : index
    %603 = vector.load %arg11[%602, %c0_166, %c0_167] : memref<16x4x128xf32, #tpu.memory_space<vmem>>, vector<1x4x128xf32>
    %604 = vector.shape_cast %603 : vector<1x4x128xf32> to vector<4x128xf32>
    %605 = arith.truncf %598 : vector<4x32xf32> to vector<4x32xbf16>
    %cst_168 = arith.constant dense<0.000000e+00> : vector<4x128xf32>
    %606 = tpu.matmul %605, %79, %cst_168 {dimension_numbers = #tpu.dot_dimension_numbers<[1], [0], [0], [1], [0, 0, 1, 1], [], []>} : vector<4x32xbf16>, vector<32x128xbf16>, vector<4x128xf32> -> vector<4x128xf32>
    %607 = arith.addf %604, %606 : vector<4x128xf32>
    %608 = arith.negf %607 : vector<4x128xf32>
    %609 = math.exp %608 : vector<4x128xf32>
    %cst_169 = arith.constant 1.000000e+00 : f32
    %610 = vector.broadcast %cst_169 : f32 to vector<4x128xf32>
    %611 = arith.addf %610, %609 : vector<4x128xf32>
    %612 = arith.divf %610, %611 : vector<4x128xf32>
    %613 = vector.extract_strided_slice %612 {offsets = [0, 0], sizes = [4, 32], strides = [1, 1]} : vector<4x128xf32> to vector<4x32xf32>
    %614 = vector.extract_strided_slice %612 {offsets = [0, 32], sizes = [4, 32], strides = [1, 1]} : vector<4x128xf32> to vector<4x32xf32>
    %615 = vector.extract_strided_slice %612 {offsets = [0, 64], sizes = [4, 32], strides = [1, 1]} : vector<4x128xf32> to vector<4x32xf32>
    %cst_170 = arith.constant 2.000000e+00 : f32
    %616 = vector.broadcast %cst_170 : f32 to vector<4x32xf32>
    %617 = arith.mulf %616, %615 : vector<4x32xf32>
    %cst_171 = arith.constant 1.000000e+00 : f32
    %618 = vector.broadcast %cst_171 : f32 to vector<4x32xf32>
    %619 = arith.subf %617, %618 : vector<4x32xf32>
    %620 = vector.extract_strided_slice %612 {offsets = [0, 96], sizes = [4, 32], strides = [1, 1]} : vector<4x128xf32> to vector<4x32xf32>
    %621 = arith.mulf %614, %601 : vector<4x32xf32>
    %622 = arith.mulf %613, %619 : vector<4x32xf32>
    %623 = arith.addf %621, %622 : vector<4x32xf32>
    %624 = math.tanh %623 : vector<4x32xf32>
    %625 = arith.mulf %620, %624 : vector<4x32xf32>
    %626 = vector.broadcast %c13_i32 : i32 to vector<4x1xi32>
    %627 = arith.cmpi sgt, %78, %626 : vector<4x1xi32>
    %cst_172 = arith.constant 0.000000e+00 : f32
    %628 = vector.shape_cast %627 : vector<4x1xi1> to vector<4x1xi1>
    %629 = vector.broadcast %628 : vector<4x1xi1> to vector<4x32xi1>
    %630 = vector.broadcast %cst_172 : f32 to vector<4x32xf32>
    %631 = arith.select %629, %625, %630 : vector<4x32xi1>, vector<4x32xf32>
    %632 = arith.index_cast %c13_i32 : i32 to index
    %c0_173 = arith.constant 0 : index
    %c0_174 = arith.constant 0 : index
    %633 = vector.load %arg8[%632, %c0_173, %c0_174] : memref<16x4x32xf32, #tpu.memory_space<vmem>>, vector<1x4x32xf32>
    %634 = vector.shape_cast %633 : vector<1x4x32xf32> to vector<4x32xf32>
    %635 = vector.shape_cast %631 : vector<4x32xf32> to vector<1x4x32xf32>
    tpu.vector_store %arg8[%632, %c0_173, %c0_174], %635 {strides = array<i32>} : memref<16x4x32xf32, #tpu.memory_space<vmem>>, vector<1x4x32xf32>,
    %636 = vector.shape_cast %627 : vector<4x1xi1> to vector<4x1xi1>
    %637 = vector.broadcast %636 : vector<4x1xi1> to vector<4x32xi1>
    %638 = arith.select %637, %625, %598 : vector<4x32xi1>, vector<4x32xf32>
    %639 = vector.shape_cast %627 : vector<4x1xi1> to vector<4x1xi1>
    %640 = vector.broadcast %639 : vector<4x1xi1> to vector<4x32xi1>
    %641 = arith.select %640, %623, %601 : vector<4x32xi1>, vector<4x32xf32>
    %c14_i32 = arith.constant 14 : i32
    %642 = arith.index_cast %c14_i32 : i32 to index
    %c0_175 = arith.constant 0 : index
    %c0_176 = arith.constant 0 : index
    %643 = vector.load %arg11[%642, %c0_175, %c0_176] : memref<16x4x128xf32, #tpu.memory_space<vmem>>, vector<1x4x128xf32>
    %644 = vector.shape_cast %643 : vector<1x4x128xf32> to vector<4x128xf32>
    %645 = arith.truncf %638 : vector<4x32xf32> to vector<4x32xbf16>
    %cst_177 = arith.constant dense<0.000000e+00> : vector<4x128xf32>
    %646 = tpu.matmul %645, %79, %cst_177 {dimension_numbers = #tpu.dot_dimension_numbers<[1], [0], [0], [1], [0, 0, 1, 1], [], []>} : vector<4x32xbf16>, vector<32x128xbf16>, vector<4x128xf32> -> vector<4x128xf32>
    %647 = arith.addf %644, %646 : vector<4x128xf32>
    %648 = arith.negf %647 : vector<4x128xf32>
    %649 = math.exp %648 : vector<4x128xf32>
    %cst_178 = arith.constant 1.000000e+00 : f32
    %650 = vector.broadcast %cst_178 : f32 to vector<4x128xf32>
    %651 = arith.addf %650, %649 : vector<4x128xf32>
    %652 = arith.divf %650, %651 : vector<4x128xf32>
    %653 = vector.extract_strided_slice %652 {offsets = [0, 0], sizes = [4, 32], strides = [1, 1]} : vector<4x128xf32> to vector<4x32xf32>
    %654 = vector.extract_strided_slice %652 {offsets = [0, 32], sizes = [4, 32], strides = [1, 1]} : vector<4x128xf32> to vector<4x32xf32>
    %655 = vector.extract_strided_slice %652 {offsets = [0, 64], sizes = [4, 32], strides = [1, 1]} : vector<4x128xf32> to vector<4x32xf32>
    %cst_179 = arith.constant 2.000000e+00 : f32
    %656 = vector.broadcast %cst_179 : f32 to vector<4x32xf32>
    %657 = arith.mulf %656, %655 : vector<4x32xf32>
    %cst_180 = arith.constant 1.000000e+00 : f32
    %658 = vector.broadcast %cst_180 : f32 to vector<4x32xf32>
    %659 = arith.subf %657, %658 : vector<4x32xf32>
    %660 = vector.extract_strided_slice %652 {offsets = [0, 96], sizes = [4, 32], strides = [1, 1]} : vector<4x128xf32> to vector<4x32xf32>
    %661 = arith.mulf %654, %641 : vector<4x32xf32>
    %662 = arith.mulf %653, %659 : vector<4x32xf32>
    %663 = arith.addf %661, %662 : vector<4x32xf32>
    %664 = math.tanh %663 : vector<4x32xf32>
    %665 = arith.mulf %660, %664 : vector<4x32xf32>
    %666 = vector.broadcast %c14_i32 : i32 to vector<4x1xi32>
    %667 = arith.cmpi sgt, %78, %666 : vector<4x1xi32>
    %cst_181 = arith.constant 0.000000e+00 : f32
    %668 = vector.shape_cast %667 : vector<4x1xi1> to vector<4x1xi1>
    %669 = vector.broadcast %668 : vector<4x1xi1> to vector<4x32xi1>
    %670 = vector.broadcast %cst_181 : f32 to vector<4x32xf32>
    %671 = arith.select %669, %665, %670 : vector<4x32xi1>, vector<4x32xf32>
    %672 = arith.index_cast %c14_i32 : i32 to index
    %c0_182 = arith.constant 0 : index
    %c0_183 = arith.constant 0 : index
    %673 = vector.load %arg8[%672, %c0_182, %c0_183] : memref<16x4x32xf32, #tpu.memory_space<vmem>>, vector<1x4x32xf32>
    %674 = vector.shape_cast %673 : vector<1x4x32xf32> to vector<4x32xf32>
    %675 = vector.shape_cast %671 : vector<4x32xf32> to vector<1x4x32xf32>
    tpu.vector_store %arg8[%672, %c0_182, %c0_183], %675 {strides = array<i32>} : memref<16x4x32xf32, #tpu.memory_space<vmem>>, vector<1x4x32xf32>,
    %676 = vector.shape_cast %667 : vector<4x1xi1> to vector<4x1xi1>
    %677 = vector.broadcast %676 : vector<4x1xi1> to vector<4x32xi1>
    %678 = arith.select %677, %665, %638 : vector<4x32xi1>, vector<4x32xf32>
    %679 = vector.shape_cast %667 : vector<4x1xi1> to vector<4x1xi1>
    %680 = vector.broadcast %679 : vector<4x1xi1> to vector<4x32xi1>
    %681 = arith.select %680, %663, %641 : vector<4x32xi1>, vector<4x32xf32>
    %c15_i32 = arith.constant 15 : i32
    %682 = arith.index_cast %c15_i32 : i32 to index
    %c0_184 = arith.constant 0 : index
    %c0_185 = arith.constant 0 : index
    %683 = vector.load %arg11[%682, %c0_184, %c0_185] : memref<16x4x128xf32, #tpu.memory_space<vmem>>, vector<1x4x128xf32>
    %684 = vector.shape_cast %683 : vector<1x4x128xf32> to vector<4x128xf32>
    %685 = arith.truncf %678 : vector<4x32xf32> to vector<4x32xbf16>
    %cst_186 = arith.constant dense<0.000000e+00> : vector<4x128xf32>
    %686 = tpu.matmul %685, %79, %cst_186 {dimension_numbers = #tpu.dot_dimension_numbers<[1], [0], [0], [1], [0, 0, 1, 1], [], []>} : vector<4x32xbf16>, vector<32x128xbf16>, vector<4x128xf32> -> vector<4x128xf32>
    %687 = arith.addf %684, %686 : vector<4x128xf32>
    %688 = arith.negf %687 : vector<4x128xf32>
    %689 = math.exp %688 : vector<4x128xf32>
    %cst_187 = arith.constant 1.000000e+00 : f32
    %690 = vector.broadcast %cst_187 : f32 to vector<4x128xf32>
    %691 = arith.addf %690, %689 : vector<4x128xf32>
    %692 = arith.divf %690, %691 : vector<4x128xf32>
    %693 = vector.extract_strided_slice %692 {offsets = [0, 0], sizes = [4, 32], strides = [1, 1]} : vector<4x128xf32> to vector<4x32xf32>
    %694 = vector.extract_strided_slice %692 {offsets = [0, 32], sizes = [4, 32], strides = [1, 1]} : vector<4x128xf32> to vector<4x32xf32>
    %695 = vector.extract_strided_slice %692 {offsets = [0, 64], sizes = [4, 32], strides = [1, 1]} : vector<4x128xf32> to vector<4x32xf32>
    %cst_188 = arith.constant 2.000000e+00 : f32
    %696 = vector.broadcast %cst_188 : f32 to vector<4x32xf32>
    %697 = arith.mulf %696, %695 : vector<4x32xf32>
    %cst_189 = arith.constant 1.000000e+00 : f32
    %698 = vector.broadcast %cst_189 : f32 to vector<4x32xf32>
    %699 = arith.subf %697, %698 : vector<4x32xf32>
    %700 = vector.extract_strided_slice %692 {offsets = [0, 96], sizes = [4, 32], strides = [1, 1]} : vector<4x128xf32> to vector<4x32xf32>
    %701 = arith.mulf %694, %681 : vector<4x32xf32>
    %702 = arith.mulf %693, %699 : vector<4x32xf32>
    %703 = arith.addf %701, %702 : vector<4x32xf32>
    %704 = math.tanh %703 : vector<4x32xf32>
    %705 = arith.mulf %700, %704 : vector<4x32xf32>
    %706 = vector.broadcast %c15_i32 : i32 to vector<4x1xi32>
    %707 = arith.cmpi sgt, %78, %706 : vector<4x1xi32>
    %cst_190 = arith.constant 0.000000e+00 : f32
    %708 = vector.shape_cast %707 : vector<4x1xi1> to vector<4x1xi1>
    %709 = vector.broadcast %708 : vector<4x1xi1> to vector<4x32xi1>
    %710 = vector.broadcast %cst_190 : f32 to vector<4x32xf32>
    %711 = arith.select %709, %705, %710 : vector<4x32xi1>, vector<4x32xf32>
    %712 = arith.index_cast %c15_i32 : i32 to index
    %c0_191 = arith.constant 0 : index
    %c0_192 = arith.constant 0 : index
    %713 = vector.load %arg8[%712, %c0_191, %c0_192] : memref<16x4x32xf32, #tpu.memory_space<vmem>>, vector<1x4x32xf32>
    %714 = vector.shape_cast %713 : vector<1x4x32xf32> to vector<4x32xf32>
    %715 = vector.shape_cast %711 : vector<4x32xf32> to vector<1x4x32xf32>
    tpu.vector_store %arg8[%712, %c0_191, %c0_192], %715 {strides = array<i32>} : memref<16x4x32xf32, #tpu.memory_space<vmem>>, vector<1x4x32xf32>,
    %716 = vector.shape_cast %707 : vector<4x1xi1> to vector<4x1xi1>
    %717 = vector.broadcast %716 : vector<4x1xi1> to vector<4x32xi1>
    %718 = arith.select %717, %705, %678 : vector<4x32xi1>, vector<4x32xf32>
    %719 = vector.shape_cast %707 : vector<4x1xi1> to vector<4x1xi1>
    %720 = vector.broadcast %719 : vector<4x1xi1> to vector<4x32xi1>
    %721 = arith.select %720, %703, %681 : vector<4x32xi1>, vector<4x32xf32>
    %c16_i32 = arith.constant 16 : i32
    %c0_193 = arith.constant 0 : index
    %c0_194 = arith.constant 0 : index
    %722 = vector.load %arg9[%c0_193, %c0_194] : memref<4x32xf32, #tpu.memory_space<vmem>>, vector<4x32xf32>
    tpu.vector_store %arg9[%c0_193, %c0_194], %718 {strides = array<i32>} : memref<4x32xf32, #tpu.memory_space<vmem>>, vector<4x32xf32>,
    %c0_195 = arith.constant 0 : index
    %c0_196 = arith.constant 0 : index
    %723 = vector.load %arg10[%c0_195, %c0_196] : memref<4x32xf32, #tpu.memory_space<vmem>>, vector<4x32xf32>
    tpu.vector_store %arg10[%c0_195, %c0_196], %721 {strides = array<i32>} : memref<4x32xf32, #tpu.memory_space<vmem>>, vector<4x32xf32>,
    return
  }
  func.func @transform_0(%arg0: i32) -> (i32, i32) {
    %c0_i32 = arith.constant 0 : i32
    %c0_i32_0 = arith.constant 0 : i32
    %c0_i32_1 = arith.constant 0 : i32
    return %c0_i32, %c0_i32_0 : i32, i32
  }
  func.func @transform_1(%arg0: i32) -> (i32, i32) {
    %c0_i32 = arith.constant 0 : i32
    %c0_i32_0 = arith.constant 0 : i32
    %c0_i32_1 = arith.constant 0 : i32
    return %c0_i32, %c0_i32_0 : i32, i32
  }
  func.func @transform_2(%arg0: i32) -> (i32, i32) {
    %c0_i32 = arith.constant 0 : i32
    %c0_i32_0 = arith.constant 0 : i32
    %c0_i32_1 = arith.constant 0 : i32
    return %c0_i32, %c0_i32_0 : i32, i32
  }
  func.func @transform_3(%arg0: i32) -> (i32, i32) {
    %c0_i32 = arith.constant 0 : i32
    %c0_i32_0 = arith.constant 0 : i32
    %c0_i32_1 = arith.constant 0 : i32
    return %c0_i32, %c0_i32_0 : i32, i32
  }
  func.func @transform_4(%arg0: i32) -> (i32, i32) {
    %c0_i32 = arith.constant 0 : i32
    %c0_i32_0 = arith.constant 0 : i32
    %c0_i32_1 = arith.constant 0 : i32
    return %c0_i32, %c0_i32_0 : i32, i32
  }
  func.func @transform_5(%arg0: i32) -> (i32, i32) {
    %c0_i32 = arith.constant 0 : i32
    %c0_i32_0 = arith.constant 0 : i32
    %c0_i32_1 = arith.constant 0 : i32
    return %c0_i32, %c0_i32_0 : i32, i32
  }
  func.func @transform_6(%arg0: i32) -> (i32, i32) {
    %c0_i32 = arith.constant 0 : i32
    %c0_i32_0 = arith.constant 0 : i32
    %c0_i32_1 = arith.constant 0 : i32
    return %c0_i32, %c0_i32_0 : i32, i32
  }
  func.func @transform_7(%arg0: i32) -> (i32, i32, i32) {
    %c0_i32 = arith.constant 0 : i32
    %c0_i32_0 = arith.constant 0 : i32
    %c0_i32_1 = arith.constant 0 : i32
    %c0_i32_2 = arith.constant 0 : i32
    return %c0_i32, %c0_i32_0, %c0_i32_1 : i32, i32, i32
  }
  func.func @transform_8(%arg0: i32) -> (i32, i32) {
    %c0_i32 = arith.constant 0 : i32
    %c0_i32_0 = arith.constant 0 : i32
    %c0_i32_1 = arith.constant 0 : i32
    return %c0_i32, %c0_i32_0 : i32, i32
  }
  func.func @transform_9(%arg0: i32) -> (i32, i32) {
    %c0_i32 = arith.constant 0 : i32
    %c0_i32_0 = arith.constant 0 : i32
    %c0_i32_1 = arith.constant 0 : i32
    return %c0_i32, %c0_i32_0 : i32, i32
  }
}

</mosaic_0001>

<bundles_post_ra>
// kernel: _encoder_device.1
= control target key start
LH: loop header
LB: loop body
LE: loop exit
PB: predicated region body
PF: predicated region fallthrough
CT: control target
= control target key end

     0   :  { %15 = vsyncpa [#allocation4], 0  ;;  %v2343_v2 = vmov 0   ;;  %s3048_s0 = inlined_call_operand.vmem [shape: s32[64,1], index: 0, kind: input, shape index: {}]   ;;  %s3049_s1 = inlined_call_operand.vmem [shape: s32[4,1], index: 1, kind: input, shape index: {}]   ;;  %s3050_s2 = inlined_call_operand.vmem [shape: f32[32,32], index: 2, kind: input, shape index: {}]   ;;  %s3051_s3 = inlined_call_operand.vmem [shape: f32[32,128], index: 3, kind: input, shape index: {}]   ;;  %s3052_s4 = inlined_call_operand.vmem [shape: bf16[32,128], index: 4, kind: input, shape index: {}]   ;;  %s3053_s5 = inlined_call_operand.vmem [shape: f32[1,128], index: 5, kind: input, shape index: {}]   ;;  %s3054_s6 = inlined_call_operand.vmem [shape: f32[64,32], index: 6, kind: output, shape index: {0}]   ;;  %s3055_s7 = inlined_call_operand.vmem [shape: f32[16,4,32], index: 7, kind: output, shape index: {1}]   ;;  %s3056_s8 = inlined_call_operand.hbm [shape: f32[4,32], index: 8, kind: output, shape index: {2}]   ;;  %s3057_s9 = inlined_call_operand.hbm [shape: f32[4,32], index: 9, kind: output, shape index: {3}]  }
   0x1   :  { %v32_v0 = vld [vmem:[%s3048_s0 + $0x10] sm:$0xff]  ;;  %v30_v1 = vld [vmem:[%s3048_s0] sm:$0xff]  ;;  %2197 = vset.pattern.permute.xlu1 %v2343_v2  ;;  %2196 = vset.pattern.permute.xlu0 %v2343_v2  ;;  %v33_v3 = vld [vmem:[%s3048_s0 + $0x18] sm:$0xff] }
   0x2   :  { %47 = vperm.xlu1 %2197, %v32_v0   ;;  %41 = vperm.xlu0 %2196, %v30_v1   ;;  %v91_v4 = vld [vmem:[%s3050_s2 + $0x18] sm:$0xff]  ;;  %v31_v5 = vld [vmem:[%s3048_s0 + $0x8] sm:$0xff]  ;;  %v90_v7 = vld [vmem:[%s3050_s2 + $0x10] sm:$0xff] }
   0x3   :  { %2020 = vmatprep.subr.mxu0 %v91_v4  ;;  %v233_v6 = vld [vmem:[%s3051_s3 + $0x18] sm:$0xff]  ;;  %v232_v8 = vld [vmem:[%s3051_s3 + $0x10] sm:$0xff]  ;;  %v89_v9 = vld [vmem:[%s3050_s2 + $0x8] sm:$0xff] }
   0x4   :  { %2021 = vmatpush3.msra.mxu0 %v91_v4  ;;  %2040 = vmatprep.subr.mxu1 %v233_v6  ;;  %v231_v10 = vld [vmem:[%s3051_s3 + $0x8] sm:$0xff]  ;;  %v34_v12 = vld [vmem:[%s3048_s0 + $0x20] sm:$0xff] }
   0x5   :  { %2022 = vmatprep.subr.mxu0 %v90_v7  ;;  %2041 = vmatpush3.msra.mxu1 %v233_v6  ;;  %v35_v11 = vld [vmem:[%s3048_s0 + $0x28] sm:$0xff] }
   0x6   :  { %50 = vperm.xlu1 %2197, %v33_v3   ;;  %44 = vperm.xlu0 %2196, %v31_v5  }
   0x7   :  { %2023 = vmatpush3.msra.mxu0 %v90_v7  ;;  %2042 = vmatprep.subr.mxu1 %v232_v8 }
   0x8   :  { %16 = vsyncpa [#allocation6], 0  ;;  %2024 = vmatprep.subr.mxu0 %v89_v9  ;;  %2043 = vmatpush3.msra.mxu1 %v232_v8  ;;  %v88_v13 = vld [vmem:[%s3050_s2] sm:$0xff]  ;;  %v37_v15 = vld [vmem:[%s3048_s0 + $0x38] sm:$0xff]  ;;  %v2344_v17 = vmov 0.0   ;;  %v38_v18 = vlaneseq  ;;  %vm92_vm0 = vcmask 261120  }
   0x9   :  { %2025 = vmatpush3.msra.mxu0 %v89_v9  ;;  %2044 = vmatprep.subr.mxu1 %v231_v10  ;;  %v230_v14 = vld [vmem:[%s3051_s3] sm:$0xff]  ;;  %v36_v16 = vld [vmem:[%s3048_s0 + $0x30] sm:$0xff]  ;;  %v2459_v25 = vld [vmem:[%s3052_s4 + $0x8] sm:$0xff]   ;;  %vm2345_vm9 = vmmov 0   ;;  %s2347_s19 = smov 32   ;;  %s2348_s13 = smov 96  }
   0xa   :  { %56 = vperm.xlu1 %2197, %v35_v11   ;;  %53 = vperm.xlu0 %2196, %v34_v12   ;;  %v39_v19 = vand.u32 127, %v38_v18  ;;  %v2472_v30 = vld [vmem:[%s3052_s4] sm:$0xff]   ;;  %s2349_s14 = smov [#allocation5]  }
   0xb   :  { %2026 = vmatprep.subr.mxu0 %v88_v13  ;;  %2045 = vmatpush3.msra.mxu1 %v231_v10  ;;  %v1875_v38 = vld [vmem:[%s3053_s5] ss:$0 sm:$0xff]  ;;  %s1843_s15 = sshll.u32 %s2349_s14, 4  ;;  %s1844_s15 = int_to_ptr.vmem [resolvable:$true] %s1843_s15 }
   0xc   :  { %2027 = vmatpush3.msra.mxu0 %v88_v13  ;;  %2046 = vmatprep.subr.mxu1 %v230_v14  ;;  %v2544_v10 = vld [vmem:[%s3049_s1] sm:$0xf]  ;;  %s2299_s16 = scalar_lea.vmem %s1844_s15, 64  ;;  %p2304_p1 = scmp.lt.s32.totalorder %s1844_s15, %s1844_s15 }
   0xd   :  { %2047 = vmatpush3.msra.mxu1 %v230_v14  ;;  %2060 = vmatprep.subr.bf16.mxu0 %v2344_v17  ;;  %vm464_vm10 = vcmp.gt.s32.totalorder %v2544_v10, 0  ;;  %vm552_vm12 = vcmp.gt.s32.totalorder %v2544_v10, 1  ;;  %vm641_vm14 = vcmp.gt.s32.totalorder %v2544_v10, 2  ;;  %p2300_p0 = scmp.ne.s32.totalorder %s1844_s15, %s2299_s16  ;;  %p2305_p2 = scmp.lt.s32.totalorder %s2299_s16, %s2299_s16 }
   0xe   :  { %62 = vperm.xlu1 %2197, %v37_v15   ;;  %59 = vperm.xlu0 %2196, %v36_v16   ;;  %v465_v13 = vsel %vm464_vm10, 1, %v2343_v2  ;;  %vm1086_vm10 = vcmp.gt.s32.totalorder %v2544_v10, 7 }
   0xf   :  { %2068 = vmatprep.subr.bf16.mxu1 %v2344_v17  ;;  %p2306_p3 = por %p2305_p2, %p2304_p1 }
  0x11   :  { %p2307_p4 = pnand %p2306_p3, %p2300_p0 }
  0x7d   :  { %v48_v20 = vpop.permute.xlu1 %47  ;;  %v42_v21 = vpop.permute.xlu0 %41 }
  0x7e   :  { %vm64_vm1 = vcmp.eq.s32.totalorder %v42_v21, %v39_v19  ;;  %vm66_vm2 = vcmp.eq.s32.totalorder %v48_v20, %v39_v19 }
  0x7f   :  { %v1859_v22 = vsel %vm64_vm1, 1.0, %v2344_v17  ;;  %v1861_v26 = vsel %vm66_vm2, 1.0, %v2344_v17  ;;  %vm730_vm1 = vcmp.gt.s32.totalorder %v2544_v10, 3 }
  0x80   :  { %2028 = vmatprep.mubr.msk.f32.mxu0 %vm92_vm0, %v1859_v22  ;;  %2048 = vmatprep.mubr.msk.f32.mxu1 %vm92_vm0, %v1859_v22 }
  0x81   :  { %v51_v23 = vpop.permute.xlu1 %50  ;;  %v45_v24 = vpop.permute.xlu0 %44 }
  0x82   :  { %vm65_vm3 = vcmp.eq.s32.totalorder %v45_v24, %v39_v19  ;;  %vm67_vm4 = vcmp.eq.s32.totalorder %v51_v23, %v39_v19 }
  0x83   :  { %v1860_v27 = vsel %vm65_vm3, 1.0, %v2344_v17  ;;  %v1862_v31 = vsel %vm67_vm4, 1.0, %v2344_v17  ;;  %vm819_vm3 = vcmp.gt.s32.totalorder %v2544_v10, 4 }
  0x84   :  { %2029 = vmatmul.mubr.msk.f32.vlgmr.msra.gmra.mxu0 %vm92_vm0, %v1860_v27  ;;  %2049 = vmatmul.mubr.msk.f32.vlgmr.msra.gmra.mxu1 %vm92_vm0, %v1860_v27 }
  0x85   :  { %2061 = vmatpush3.bf16.msra.mxu0 %v2459_v25  ;;  %v57_v28 = vpop.permute.xlu1 %56  ;;  %2031 = vmatprep.mubr.msk.f32.mxu0 %vm92_vm0, %v1861_v26  ;;  %v54_v29 = vpop.permute.xlu0 %53 }
  0x86   :  { %2051 = vmatprep.mubr.msk.f32.mxu1 %vm92_vm0, %v1861_v26  ;;  %vm68_vm5 = vcmp.eq.s32.totalorder %v54_v29, %v39_v19  ;;  %2062 = vmatprep.subr.bf16.mxu0 %v2344_v17  ;;  %vm69_vm6 = vcmp.eq.s32.totalorder %v57_v28, %v39_v19 }
  0x87   :  { %v1863_v32 = vsel %vm68_vm5, 1.0, %v2344_v17  ;;  %2069 = vmatpush3.bf16.msra.mxu1 %v2459_v25  ;;  %v1864_v35 = vsel %vm69_vm6, 1.0, %v2344_v17  ;;  %vm908_vm5 = vcmp.gt.s32.totalorder %v2544_v10, 5 }
  0x88   :  { %2032 = vmatmul.mubr.msk.f32.gmra.mxu0 %vm92_vm0, %v1862_v31  ;;  %2052 = vmatmul.mubr.msk.f32.gmra.mxu1 %vm92_vm0, %v1862_v31 }
  0x89   :  { %v63_v33 = vpop.permute.xlu1 %62  ;;  %2034 = vmatprep.mubr.msk.f32.mxu0 %vm92_vm0, %v1863_v32  ;;  %2054 = vmatprep.mubr.msk.f32.mxu1 %vm92_vm0, %v1863_v32  ;;  %v60_v34 = vpop.permute.xlu0 %59 }
  0x8a   :  { %vm70_vm7 = vcmp.eq.s32.totalorder %v60_v34, %v39_v19  ;;  %2063 = vmatpush3.bf16.msra.mxu0 %v2472_v30  ;;  %2070 = vmatprep.subr.bf16.mxu1 %v2344_v17  ;;  %vm71_vm8 = vcmp.eq.s32.totalorder %v63_v33, %v39_v19 }
  0x8b   :  { %v1865_v36 = vsel %vm70_vm7, 1.0, %v2344_v17  ;;  %2071 = vmatpush3.bf16.msra.mxu1 %v2472_v30  ;;  %2076 = vmatprep.subr.bf16.mxu0 %v2344_v17  ;;  %v1866_v37 = vsel %vm71_vm8, 1.0, %v2344_v17  ;;  %vm997_vm7 = vcmp.gt.s32.totalorder %v2544_v10, 6 }
  0x8c   :  { %2035 = vmatmul.mubr.msk.f32.gmra.mxu0 %vm92_vm0, %v1864_v35  ;;  %2055 = vmatmul.mubr.msk.f32.gmra.mxu1 %vm92_vm0, %v1864_v35 }
  0x8d   :  { %2037 = vmatprep.mubr.msk.f32.mxu0 %vm92_vm0, %v1865_v36  ;;  %2057 = vmatprep.mubr.msk.f32.mxu1 %vm92_vm0, %v1865_v36 }
  0x8e   :  { %2084 = vmatprep.subr.bf16.mxu1 %v2344_v17 }
  0x90   :  { %2038 = vmatmul.mubr.msk.f32.gmra.mxu0 %vm92_vm0, %v1866_v37  ;;  %2058 = vmatmul.mubr.msk.f32.gmra.mxu1 %vm92_vm0, %v1866_v37 }
  0x91   :  { %2064 = vmatprep.mubr.msk.bf16.mxu0 %vm2345_vm9, %v2344_v17  ;;  %2072 = vmatprep.mubr.msk.bf16.mxu1 %vm2345_vm9, %v2344_v17 }
  0x94   :  { %2065 = vmatmul.mubr.bf16.vlgmr.msra.gmra.mxu0 %v2343_v2 }
  0x95   :  { %2077 = vmatpush3.bf16.msra.mxu0 %v2459_v25  ;;  %2080 = vmatprep.mubr.msk.bf16.mxu0 %vm2345_vm9, %v2344_v17 }
  0x96   :  { %2078 = vmatprep.subr.bf16.mxu0 %v2344_v17 }
  0x99   :  { %2079 = vmatpush3.bf16.msra.mxu0 %v2472_v30 }
  0x9a   :  { %2092 = vmatprep.subr.bf16.mxu0 %v2344_v17 }
 0x144   :  { %v2030_v39 = vpop.f32.mrf.mxu0  ;;  %v2050_v40 = vpop.f32.mrf.mxu1 }
 0x145   :  { %223 = vst.msk [vmem:[%s3054_s6 + $0x8] sm:$0xff] %vm92_vm0, %v2030_v39  ;;  %v313_v41 = vadd.f32 %v2050_v40, %v1875_v38 }
 0x146   :  { %v183_v42 = vpop.f32.mrf.mxu0  ;;  %v307_v43 = vpop.f32.mrf.mxu1 }
 0x147   :  { %350 = vst [vmem:[#allocation2 + $0x8] sm:$0xff] %v313_v41   ;;  %222 = vst.msk [vmem:[%s3054_s6] sm:$0xff] %vm92_vm0, %v183_v42  ;;  %v308_v44 = vadd.f32 %v1875_v38, %v307_v43  ;;  %v553_v41 = vsel %vm552_vm12, 1, %v2343_v2  ;;  %vm1175_vm12 = vcmp.gt.s32.totalorder %v2544_v10, 8 }
 0x148   :  { %v2033_v45 = vpop.f32.mrf.mxu0  ;;  %v2053_v46 = vpop.f32.mrf.mxu1 }
 0x149   :  { %346 = vst [vmem:[#allocation2] sm:$0xff] %v308_v44   ;;  %225 = vst.msk [vmem:[%s3054_s6 + $0x18] sm:$0xff] %vm92_vm0, %v2033_v45  ;;  %v323_v47 = vadd.f32 %v2053_v46, %v1875_v38 }
 0x14a   :  { %v193_v48 = vpop.f32.mrf.mxu0  ;;  %v317_v49 = vpop.f32.mrf.mxu1 }
 0x14b   :  { %358 = vst [vmem:[#allocation2 + $0x18] sm:$0xff] %v323_v47   ;;  %224 = vst.msk [vmem:[%s3054_s6 + $0x10] sm:$0xff] %vm92_vm0, %v193_v48  ;;  %v318_v50 = vadd.f32 %v1875_v38, %v317_v49 }
 0x14c   :  { %v2036_v51 = vpop.f32.mrf.mxu0  ;;  %v2056_v52 = vpop.f32.mrf.mxu1 }
 0x14d   :  { %354 = vst [vmem:[#allocation2 + $0x10] sm:$0xff] %v318_v50   ;;  %227 = vst.msk [vmem:[%s3054_s6 + $0x28] sm:$0xff] %vm92_vm0, %v2036_v51  ;;  %v333_v53 = vadd.f32 %v2056_v52, %v1875_v38 }
 0x14e   :  { %v203_v54 = vpop.f32.mrf.mxu0  ;;  %v327_v55 = vpop.f32.mrf.mxu1 }
 0x14f   :  { %366 = vst [vmem:[#allocation2 + $0x28] sm:$0xff] %v333_v53   ;;  %226 = vst.msk [vmem:[%s3054_s6 + $0x20] sm:$0xff] %vm92_vm0, %v203_v54  ;;  %v328_v56 = vadd.f32 %v1875_v38, %v327_v55  ;;  %v567_v55 = vld [vmem:[#allocation2 + $0x8] sm:$0xf] }
 0x150   :  { %v2039_v57 = vpop.f32.mrf.mxu0  ;;  %v2059_v58 = vpop.f32.mrf.mxu1  ;;  %v382_v63 = vld [vmem:[#allocation2] sm:$0xf]  ;;  %v478_v28 = vld [vmem:[#allocation2 + $0x4] sm:$0xf] }
 0x151   :  { %362 = vst [vmem:[#allocation2 + $0x20] sm:$0xff] %v328_v56   ;;  %229 = vst.msk [vmem:[%s3054_s6 + $0x38] sm:$0xff] %vm92_vm0, %v2039_v57  ;;  %v343_v59 = vadd.f32 %v2059_v58, %v1875_v38 }
 0x152   :  { %v213_v60 = vpop.f32.mrf.mxu0  ;;  %v337_v61 = vpop.f32.mrf.mxu1 }
 0x153   :  { %374 = vst [vmem:[#allocation2 + $0x38] sm:$0xff] %v343_v59   ;;  %228 = vst.msk [vmem:[%s3054_s6 + $0x30] sm:$0xff] %vm92_vm0, %v213_v60  ;;  %v338_v62 = vadd.f32 %v1875_v38, %v337_v61  ;;  %s2346_s6 = smov 64  }
 0x154   :  { %v432_v0 = vpop.f32.mrf.mxu0 }
 0x155   :  { %370 = vst [vmem:[#allocation2 + $0x30] sm:$0xff] %v338_v62   ;;  %v438_v1 = vadd.f32 %v432_v0, %v382_v63 }
 0x156   :  { %v2066_v3 = vpop.f32.mrf.mxu0 }
 0x157   :  { %v1886_v4 = vmul.f32 -1.442695, %v438_v1 }
 0x158   :  { %v435_v5 = vpop.f32.mrf.mxu0 }
 0x159   :  { %2200 = vpow2.f32 %v1886_v4  ;;  %v642_v4 = vsel %vm641_vm14, 1, %v2343_v2 }
 0x15a   :  { %v2067_v6 = vpop.f32.mrf.mxu0 }
 0x166   :  { %v2201_v7 = vpop.eup %2200 }
 0x167   :  { %v442_v8 = vadd.f32 1.0, %v2201_v7 }
 0x169   :  { %2202 = vrcp.f32 %v442_v8 }
 0x176   :  { %v2203_v9 = vpop.eup %2202 }
 0x177   :  { %v445_v11 = vmul.f32 2.0, %v2203_v9  ;;  %v447_v16 = vmul.f32 0.0, %v2203_v9 }
 0x179   :  { %v1887_v12 = vadd.f32 -1.0, %v445_v11 }
 0x17b   :  { %449 = vrot.lane.b32.xlu0 %v1887_v12, %s2346_s6 }
 0x17f   :  { %467 = vperm.xlu0 %2196, %v465_v13  }
 0x1ed   :  { %v450_v14 = vpop.permute.xlu0 %449 }
 0x1ee   :  { %v452_v15 = vmul.f32 %v2203_v9, %v450_v14 }
 0x1f0   :  { %454 = vrot.lane.b32.xlu1 %v452_v15, %s2347_s19 }
 0x1fa   :  { %v468_v21 = vpop.permute.xlu0 %467 }
 0x1fb   :  { %vm469_vm11 = vcmp.eq.s32.totalorder %v468_v21, 1 }
 0x262   :  { %v455_v18 = vpop.permute.xlu1 %454 }
 0x263   :  { %v457_v19 = vadd.f32 %v455_v18, %v447_v16 }
 0x265   :  { %2204 = vtanh.f32 %v457_v19  ;;  %v477_v44 = vsel %vm469_vm11, %v457_v19, 0.0 }
 0x272   :  { %v2205_v20 = vpop.eup %2204 }
 0x273   :  { %460 = vrot.lane.b32.xlu1 %v2205_v20, %s2346_s6  ;;  %v656_v20 = vld [vmem:[#allocation2 + $0xc] sm:$0xf] }
 0x2e5   :  { %v461_v22 = vpop.permute.xlu1 %460 }
 0x2e6   :  { %v463_v23 = vmul.f32 %v2203_v9, %v461_v22 }
 0x2e8   :  { %v2552_v24 = vsel %vm469_vm11, %v463_v23, 0.0 }
 0x2e9   :  { %v479_v26 = vpack.c.bf16 %v2552_v24, %v2552_v24 }
 0x2eb   :  { %481 = vrot.lane.b32.xlu0 %v479_v26, %s2347_s19 }
 0x35d   :  { %v482_v27 = vpop.permute.xlu0 %481 }
 0x35e   :  { %2073 = vmatmul.mubr.msk.bf16.vlgmr.msra.gmra.mxu1 %vm92_vm0, %v482_v27 }
 0x35f   :  { %2085 = vmatpush3.bf16.msra.mxu1 %v2459_v25  ;;  %2088 = vmatprep.mubr.msk.bf16.mxu1 %vm2345_vm9, %v2344_v17 }
 0x360   :  { %2086 = vmatprep.subr.bf16.mxu1 %v2344_v17 }
 0x363   :  { %2087 = vmatpush3.bf16.msra.mxu1 %v2472_v30 }
 0x364   :  { %2100 = vmatprep.subr.bf16.mxu1 %v2344_v17 }
 0x41e   :  { %v520_v29 = vpop.f32.mrf.mxu1 }
 0x41f   :  { %v526_v31 = vadd.f32 %v520_v29, %v478_v28 }
 0x420   :  { %v2074_v32 = vpop.f32.mrf.mxu1 }
 0x421   :  { %v1889_v33 = vmul.f32 -1.442695, %v526_v31 }
 0x422   :  { %v523_v34 = vpop.f32.mrf.mxu1 }
 0x423   :  { %2206 = vpow2.f32 %v1889_v33 }
 0x424   :  { %v2075_v35 = vpop.f32.mrf.mxu1 }
 0x425   :  { %v731_v35 = vsel %vm730_vm1, 1, %v2343_v2  ;;  %vm1264_vm1 = vcmp.gt.s32.totalorder %v2544_v10, 9 }
 0x430   :  { %v2207_v36 = vpop.eup %2206 }
 0x431   :  { %v530_v37 = vadd.f32 1.0, %v2207_v36 }
 0x433   :  { %2208 = vrcp.f32 %v530_v37 }
 0x440   :  { %v2209_v38 = vpop.eup %2208 }
 0x441   :  { %v533_v39 = vmul.f32 2.0, %v2209_v38  ;;  %v535_v45 = vmul.f32 %v2209_v38, %v477_v44 }
 0x443   :  { %v1890_v40 = vadd.f32 -1.0, %v533_v39 }
 0x445   :  { %537 = vrot.lane.b32.xlu1 %v1890_v40, %s2346_s6 }
 0x449   :  { %555 = vperm.xlu1 %2197, %v553_v41  }
 0x4b7   :  { %v538_v42 = vpop.permute.xlu1 %537 }
 0x4b8   :  { %v540_v43 = vmul.f32 %v2209_v38, %v538_v42 }
 0x4ba   :  { %542 = vrot.lane.b32.xlu0 %v540_v43, %s2347_s19 }
 0x4c4   :  { %v2570_v49 = vpop.permute.xlu1 %555 }
 0x4c5   :  { %vm557_vm13 = vcmp.eq.s32.totalorder %v2570_v49, 1 }
 0x52c   :  { %v543_v46 = vpop.permute.xlu0 %542 }
 0x52d   :  { %v545_v47 = vadd.f32 %v543_v46, %v535_v45 }
 0x52f   :  { %2210 = vtanh.f32 %v545_v47  ;;  %v566_v7 = vsel %vm557_vm13, %v545_v47, %v477_v44 }
 0x53c   :  { %v2211_v48 = vpop.eup %2210 }
 0x53d   :  { %548 = vrot.lane.b32.xlu0 %v2211_v48, %s2346_s6 }
 0x5af   :  { %v549_v50 = vpop.permute.xlu0 %548 }
 0x5b0   :  { %v2572_v51 = vmul.f32 %v2209_v38, %v549_v50  ;;  %v745_v50 = vld [vmem:[#allocation2 + $0x10] sm:$0xf] }
 0x5b2   :  { %v565_v52 = vsel %vm557_vm13, %v2572_v51, %v2552_v24 }
 0x5b3   :  { %v568_v53 = vpack.c.bf16 %v565_v52, %v565_v52 }
 0x5b5   :  { %570 = vrot.lane.b32.xlu1 %v568_v53, %s2347_s19 }
 0x627   :  { %v571_v54 = vpop.permute.xlu1 %570 }
 0x628   :  { %2081 = vmatmul.mubr.msk.bf16.vlgmr.msra.gmra.mxu0 %vm92_vm0, %v571_v54 }
 0x629   :  { %2093 = vmatpush3.bf16.msra.mxu0 %v2459_v25  ;;  %2096 = vmatprep.mubr.msk.bf16.mxu0 %vm2345_vm9, %v2344_v17 }
 0x62a   :  { %2094 = vmatprep.subr.bf16.mxu0 %v2344_v17 }
 0x62d   :  { %2095 = vmatpush3.bf16.msra.mxu0 %v2472_v30 }
 0x62e   :  { %2108 = vmatprep.subr.bf16.mxu0 %v2344_v17 }
 0x6e8   :  { %v609_v56 = vpop.f32.mrf.mxu0 }
 0x6e9   :  { %v615_v57 = vadd.f32 %v609_v56, %v567_v55 }
 0x6ea   :  { %v2082_v58 = vpop.f32.mrf.mxu0 }
 0x6eb   :  { %v1893_v59 = vmul.f32 -1.442695, %v615_v57 }
 0x6ec   :  { %v612_v60 = vpop.f32.mrf.mxu0 }
 0x6ed   :  { %2212 = vpow2.f32 %v1893_v59 }
 0x6ee   :  { %v2083_v61 = vpop.f32.mrf.mxu0 }
 0x6fa   :  { %v2213_v62 = vpop.eup %2212 }
 0x6fb   :  { %v619_v63 = vadd.f32 1.0, %v2213_v62 }
 0x6fd   :  { %2214 = vrcp.f32 %v619_v63  ;;  %v820_v63 = vsel %vm819_vm3, 1, %v2343_v2 }
 0x70a   :  { %v2215_v0 = vpop.eup %2214 }
 0x70b   :  { %v622_v1 = vmul.f32 2.0, %v2215_v0  ;;  %v624_v8 = vmul.f32 %v2215_v0, %v566_v7 }
 0x70d   :  { %v1894_v3 = vadd.f32 -1.0, %v622_v1 }
 0x70f   :  { %626 = vrot.lane.b32.xlu0 %v1894_v3, %s2346_s6 }
 0x713   :  { %644 = vperm.xlu0 %2196, %v642_v4  }
 0x781   :  { %v627_v5 = vpop.permute.xlu0 %626 }
 0x782   :  { %v629_v6 = vmul.f32 %v2215_v0, %v627_v5 }
 0x784   :  { %631 = vrot.lane.b32.xlu1 %v629_v6, %s2347_s19 }
 0x78e   :  { %v2594_v13 = vpop.permute.xlu0 %644 }
 0x78f   :  { %vm646_vm15 = vcmp.eq.s32.totalorder %v2594_v13, 1 }
 0x7f6   :  { %v632_v9 = vpop.permute.xlu1 %631 }
 0x7f7   :  { %v634_v11 = vadd.f32 %v632_v9, %v624_v8 }
 0x7f9   :  { %2216 = vtanh.f32 %v634_v11  ;;  %v655_v38 = vsel %vm646_vm15, %v634_v11, %v566_v7 }
 0x806   :  { %v2217_v12 = vpop.eup %2216 }
 0x807   :  { %637 = vrot.lane.b32.xlu1 %v2217_v12, %s2346_s6 }
 0x879   :  { %v638_v14 = vpop.permute.xlu1 %637 }
 0x87a   :  { %v2596_v15 = vmul.f32 %v2215_v0, %v638_v14 }
 0x87c   :  { %v654_v16 = vsel %vm646_vm15, %v2596_v15, %v565_v52 }
 0x87d   :  { %v657_v18 = vpack.c.bf16 %v654_v16, %v654_v16 }
 0x87f   :  { %659 = vrot.lane.b32.xlu0 %v657_v18, %s2347_s19  ;;  %v834_v18 = vld [vmem:[#allocation2 + $0x14] sm:$0xf] }
 0x8f1   :  { %v660_v19 = vpop.permute.xlu0 %659 }
 0x8f2   :  { %2089 = vmatmul.mubr.msk.bf16.vlgmr.msra.gmra.mxu1 %vm92_vm0, %v660_v19 }
 0x8f3   :  { %2101 = vmatpush3.bf16.msra.mxu1 %v2459_v25  ;;  %2104 = vmatprep.mubr.msk.bf16.mxu1 %vm2345_vm9, %v2344_v17 }
 0x8f4   :  { %2102 = vmatprep.subr.bf16.mxu1 %v2344_v17 }
 0x8f7   :  { %2103 = vmatpush3.bf16.msra.mxu1 %v2472_v30 }
 0x8f8   :  { %2116 = vmatprep.subr.bf16.mxu1 %v2344_v17 }
 0x9b2   :  { %v698_v21 = vpop.f32.mrf.mxu1 }
 0x9b3   :  { %v704_v22 = vadd.f32 %v698_v21, %v656_v20 }
 0x9b4   :  { %v2090_v23 = vpop.f32.mrf.mxu1 }
 0x9b5   :  { %v1897_v26 = vmul.f32 -1.442695, %v704_v22 }
 0x9b6   :  { %v701_v27 = vpop.f32.mrf.mxu1 }
 0x9b7   :  { %2218 = vpow2.f32 %v1897_v26 }
 0x9b8   :  { %v2091_v28 = vpop.f32.mrf.mxu1 }
 0x9c4   :  { %v2219_v29 = vpop.eup %2218 }
 0x9c5   :  { %v708_v31 = vadd.f32 1.0, %v2219_v29 }
 0x9c7   :  { %2220 = vrcp.f32 %v708_v31 }
 0x9d4   :  { %v2221_v32 = vpop.eup %2220 }
 0x9d5   :  { %v711_v33 = vmul.f32 2.0, %v2221_v32  ;;  %v713_v39 = vmul.f32 %v2221_v32, %v655_v38 }
 0x9d7   :  { %v1898_v34 = vadd.f32 -1.0, %v711_v33  ;;  %v909_v33 = vsel %vm908_vm5, 1, %v2343_v2  ;;  %vm1353_vm5 = vcmp.gt.s32.totalorder %v2544_v10, 10 }
 0x9d9   :  { %715 = vrot.lane.b32.xlu1 %v1898_v34, %s2346_s6 }
 0x9dd   :  { %733 = vperm.xlu1 %2197, %v731_v35  }
 0xa4b   :  { %v716_v36 = vpop.permute.xlu1 %715 }
 0xa4c   :  { %v718_v37 = vmul.f32 %v2221_v32, %v716_v36 }
 0xa4e   :  { %720 = vrot.lane.b32.xlu0 %v718_v37, %s2347_s19 }
 0xa58   :  { %v2617_v43 = vpop.permute.xlu1 %733 }
 0xa59   :  { %vm735_vm2 = vcmp.eq.s32.totalorder %v2617_v43, 1 }
 0xac0   :  { %v721_v40 = vpop.permute.xlu0 %720 }
 0xac1   :  { %v723_v41 = vadd.f32 %v721_v40, %v713_v39 }
 0xac3   :  { %2222 = vtanh.f32 %v723_v41  ;;  %v744_v3 = vsel %vm735_vm2, %v723_v41, %v655_v38 }
 0xad0   :  { %v2223_v42 = vpop.eup %2222 }
 0xad1   :  { %726 = vrot.lane.b32.xlu0 %v2223_v42, %s2346_s6 }
 0xb43   :  { %v727_v44 = vpop.permute.xlu0 %726 }
 0xb44   :  { %v2619_v45 = vmul.f32 %v2221_v32, %v727_v44 }
 0xb46   :  { %v743_v46 = vsel %vm735_vm2, %v2619_v45, %v654_v16 }
 0xb47   :  { %v746_v47 = vpack.c.bf16 %v743_v46, %v743_v46 }
 0xb49   :  { %748 = vrot.lane.b32.xlu1 %v746_v47, %s2347_s19 }
 0xbbb   :  { %v749_v48 = vpop.permute.xlu1 %748 }
 0xbbc   :  { %2097 = vmatmul.mubr.msk.bf16.vlgmr.msra.gmra.mxu0 %vm92_vm0, %v749_v48 }
 0xbbd   :  { %2109 = vmatpush3.bf16.msra.mxu0 %v2459_v25  ;;  %2112 = vmatprep.mubr.msk.bf16.mxu0 %vm2345_vm9, %v2344_v17 }
 0xbbe   :  { %2110 = vmatprep.subr.bf16.mxu0 %v2344_v17 }
 0xbc1   :  { %2111 = vmatpush3.bf16.msra.mxu0 %v2472_v30 }
 0xbc2   :  { %2124 = vmatprep.subr.bf16.mxu0 %v2344_v17 }
 0xc7c   :  { %v787_v52 = vpop.f32.mrf.mxu0 }
 0xc7d   :  { %v793_v53 = vadd.f32 %v787_v52, %v745_v50  ;;  %v923_v50 = vld [vmem:[#allocation2 + $0x18] sm:$0xf] }
 0xc7e   :  { %v2098_v54 = vpop.f32.mrf.mxu0 }
 0xc7f   :  { %v1901_v55 = vmul.f32 -1.442695, %v793_v53 }
 0xc80   :  { %v790_v56 = vpop.f32.mrf.mxu0 }
 0xc81   :  { %2224 = vpow2.f32 %v1901_v55 }
 0xc82   :  { %v2099_v57 = vpop.f32.mrf.mxu0 }
 0xc8e   :  { %v2225_v58 = vpop.eup %2224 }
 0xc8f   :  { %v797_v59 = vadd.f32 1.0, %v2225_v58 }
 0xc91   :  { %2226 = vrcp.f32 %v797_v59 }
 0xc9e   :  { %v2227_v60 = vpop.eup %2226 }
 0xc9f   :  { %v800_v61 = vmul.f32 2.0, %v2227_v60  ;;  %v802_v4 = vmul.f32 %v2227_v60, %v744_v3 }
 0xca1   :  { %v1902_v62 = vadd.f32 -1.0, %v800_v61 }
 0xca3   :  { %804 = vrot.lane.b32.xlu0 %v1902_v62, %s2346_s6 }
 0xca7   :  { %822 = vperm.xlu0 %2196, %v820_v63   ;;  %v998_v63 = vsel %vm997_vm7, 1, %v2343_v2 }
 0xd15   :  { %v805_v0 = vpop.permute.xlu0 %804 }
 0xd16   :  { %v807_v1 = vmul.f32 %v2227_v60, %v805_v0 }
 0xd18   :  { %809 = vrot.lane.b32.xlu1 %v807_v1, %s2347_s19 }
 0xd22   :  { %v2640_v8 = vpop.permute.xlu0 %822 }
 0xd23   :  { %vm824_vm4 = vcmp.eq.s32.totalorder %v2640_v8, 1 }
 0xd8a   :  { %v810_v5 = vpop.permute.xlu1 %809 }
 0xd8b   :  { %v812_v6 = vadd.f32 %v810_v5, %v802_v4 }
 0xd8d   :  { %2228 = vtanh.f32 %v812_v6  ;;  %v833_v36 = vsel %vm824_vm4, %v812_v6, %v744_v3 }
 0xd9a   :  { %v2229_v7 = vpop.eup %2228 }
 0xd9b   :  { %815 = vrot.lane.b32.xlu1 %v2229_v7, %s2346_s6 }
 0xe0d   :  { %v816_v9 = vpop.permute.xlu1 %815 }
 0xe0e   :  { %v2642_v11 = vmul.f32 %v2227_v60, %v816_v9 }
 0xe10   :  { %v832_v12 = vsel %vm824_vm4, %v2642_v11, %v743_v46 }
 0xe11   :  { %v835_v14 = vpack.c.bf16 %v832_v12, %v832_v12 }
 0xe13   :  { %837 = vrot.lane.b32.xlu0 %v835_v14, %s2347_s19 }
 0xe85   :  { %v838_v16 = vpop.permute.xlu0 %837 }
 0xe86   :  { %2105 = vmatmul.mubr.msk.bf16.vlgmr.msra.gmra.mxu1 %vm92_vm0, %v838_v16 }
 0xe87   :  { %2117 = vmatpush3.bf16.msra.mxu1 %v2459_v25  ;;  %2120 = vmatprep.mubr.msk.bf16.mxu1 %vm2345_vm9, %v2344_v17 }
 0xe88   :  { %2118 = vmatprep.subr.bf16.mxu1 %v2344_v17 }
 0xe8b   :  { %2119 = vmatpush3.bf16.msra.mxu1 %v2472_v30 }
 0xe8c   :  { %2132 = vmatprep.subr.bf16.mxu1 %v2344_v17 }
 0xf46   :  { %v876_v19 = vpop.f32.mrf.mxu1 }
 0xf47   :  { %v882_v20 = vadd.f32 %v876_v19, %v834_v18 }
 0xf48   :  { %v2106_v21 = vpop.f32.mrf.mxu1 }
 0xf49   :  { %v1905_v22 = vmul.f32 -1.442695, %v882_v20  ;;  %v1012_v20 = vld [vmem:[#allocation2 + $0x1c] sm:$0xf] }
 0xf4a   :  { %v879_v23 = vpop.f32.mrf.mxu1 }
 0xf4b   :  { %2230 = vpow2.f32 %v1905_v22 }
 0xf4c   :  { %v2107_v26 = vpop.f32.mrf.mxu1 }
 0xf58   :  { %v2231_v27 = vpop.eup %2230 }
 0xf59   :  { %v886_v28 = vadd.f32 1.0, %v2231_v27 }
 0xf5b   :  { %2232 = vrcp.f32 %v886_v28 }
 0xf68   :  { %v2233_v29 = vpop.eup %2232 }
 0xf69   :  { %v889_v31 = vmul.f32 2.0, %v2233_v29  ;;  %v891_v37 = vmul.f32 %v2233_v29, %v833_v36 }
 0xf6b   :  { %v1906_v32 = vadd.f32 -1.0, %v889_v31 }
 0xf6d   :  { %893 = vrot.lane.b32.xlu1 %v1906_v32, %s2346_s6 }
 0xf71   :  { %911 = vperm.xlu1 %2197, %v909_v33  }
 0xfdf   :  { %v894_v34 = vpop.permute.xlu1 %893 }
 0xfe0   :  { %v896_v35 = vmul.f32 %v2233_v29, %v894_v34 }
 0xfe2   :  { %898 = vrot.lane.b32.xlu0 %v896_v35, %s2347_s19  ;;  %v1087_v35 = vsel %vm1086_vm10, 1, %v2343_v2  ;;  %vm1442_vm10 = vcmp.gt.s32.totalorder %v2544_v10, 11 }
 0xfec   :  { %v2663_v41 = vpop.permute.xlu1 %911 }
 0xfed   :  { %vm913_vm6 = vcmp.eq.s32.totalorder %v2663_v41, 1 }
0x1054   :  { %v899_v38 = vpop.permute.xlu0 %898 }
0x1055   :  { %v901_v39 = vadd.f32 %v899_v38, %v891_v37 }
0x1057   :  { %2234 = vtanh.f32 %v901_v39  ;;  %v922_v3 = vsel %vm913_vm6, %v901_v39, %v833_v36 }
0x1064   :  { %v2235_v40 = vpop.eup %2234 }
0x1065   :  { %904 = vrot.lane.b32.xlu0 %v2235_v40, %s2346_s6 }
0x10d7   :  { %v905_v42 = vpop.permute.xlu0 %904 }
0x10d8   :  { %v2665_v44 = vmul.f32 %v2233_v29, %v905_v42 }
0x10da   :  { %v921_v46 = vsel %vm913_vm6, %v2665_v44, %v832_v12 }
0x10db   :  { %v924_v47 = vpack.c.bf16 %v921_v46, %v921_v46 }
0x10dd   :  { %926 = vrot.lane.b32.xlu1 %v924_v47, %s2347_s19 }
0x114f   :  { %v927_v48 = vpop.permute.xlu1 %926 }
0x1150   :  { %2113 = vmatmul.mubr.msk.bf16.vlgmr.msra.gmra.mxu0 %vm92_vm0, %v927_v48 }
0x1151   :  { %2125 = vmatpush3.bf16.msra.mxu0 %v2459_v25  ;;  %2128 = vmatprep.mubr.msk.bf16.mxu0 %vm2345_vm9, %v2344_v17 }
0x1152   :  { %2126 = vmatprep.subr.bf16.mxu0 %v2344_v17 }
0x1155   :  { %2127 = vmatpush3.bf16.msra.mxu0 %v2472_v30 }
0x1156   :  { %2140 = vmatprep.subr.bf16.mxu0 %v2344_v17 }
0x1210   :  { %v965_v52 = vpop.f32.mrf.mxu0 }
0x1211   :  { %v971_v53 = vadd.f32 %v965_v52, %v923_v50 }
0x1212   :  { %v2114_v54 = vpop.f32.mrf.mxu0 }
0x1213   :  { %v1909_v55 = vmul.f32 -1.442695, %v971_v53 }
0x1214   :  { %v968_v56 = vpop.f32.mrf.mxu0 }
0x1215   :  { %2236 = vpow2.f32 %v1909_v55  ;;  %v1101_v55 = vld [vmem:[#allocation2 + $0x20] sm:$0xf] }
0x1216   :  { %v2115_v57 = vpop.f32.mrf.mxu0 }
0x1222   :  { %v2237_v58 = vpop.eup %2236 }
0x1223   :  { %v975_v59 = vadd.f32 1.0, %v2237_v58 }
0x1225   :  { %2238 = vrcp.f32 %v975_v59 }
0x1232   :  { %v2239_v60 = vpop.eup %2238 }
0x1233   :  { %v978_v61 = vmul.f32 2.0, %v2239_v60  ;;  %v980_v4 = vmul.f32 %v2239_v60, %v922_v3 }
0x1235   :  { %v1910_v62 = vadd.f32 -1.0, %v978_v61 }
0x1237   :  { %982 = vrot.lane.b32.xlu0 %v1910_v62, %s2346_s6 }
0x123b   :  { %1000 = vperm.xlu0 %2196, %v998_v63  }
0x12a9   :  { %v983_v0 = vpop.permute.xlu0 %982 }
0x12aa   :  { %v985_v1 = vmul.f32 %v2239_v60, %v983_v0 }
0x12ac   :  { %987 = vrot.lane.b32.xlu1 %v985_v1, %s2347_s19 }
0x12b6   :  { %v2686_v9 = vpop.permute.xlu0 %1000 }
0x12b7   :  { %vm1002_vm8 = vcmp.eq.s32.totalorder %v2686_v9, 1 }
0x131e   :  { %v988_v5 = vpop.permute.xlu1 %987 }
0x131f   :  { %v990_v6 = vadd.f32 %v988_v5, %v980_v4  ;;  %v1176_v4 = vsel %vm1175_vm12, 1, %v2343_v2 }
0x1321   :  { %2240 = vtanh.f32 %v990_v6  ;;  %v1011_v38 = vsel %vm1002_vm8, %v990_v6, %v922_v3 }
0x132e   :  { %v2241_v7 = vpop.eup %2240 }
0x132f   :  { %993 = vrot.lane.b32.xlu1 %v2241_v7, %s2346_s6 }
0x13a1   :  { %v994_v12 = vpop.permute.xlu1 %993 }
0x13a2   :  { %v2688_v14 = vmul.f32 %v2239_v60, %v994_v12 }
0x13a4   :  { %v1010_v16 = vsel %vm1002_vm8, %v2688_v14, %v921_v46 }
0x13a5   :  { %v1013_v18 = vpack.c.bf16 %v1010_v16, %v1010_v16 }
0x13a7   :  { %1015 = vrot.lane.b32.xlu0 %v1013_v18, %s2347_s19 }
0x1419   :  { %v1016_v19 = vpop.permute.xlu0 %1015 }
0x141a   :  { %2121 = vmatmul.mubr.msk.bf16.vlgmr.msra.gmra.mxu1 %vm92_vm0, %v1016_v19 }
0x141b   :  { %2133 = vmatpush3.bf16.msra.mxu1 %v2459_v25  ;;  %2136 = vmatprep.mubr.msk.bf16.mxu1 %vm2345_vm9, %v2344_v17 }
0x141c   :  { %2134 = vmatprep.subr.bf16.mxu1 %v2344_v17 }
0x141f   :  { %2135 = vmatpush3.bf16.msra.mxu1 %v2472_v30 }
0x1420   :  { %2148 = vmatprep.subr.bf16.mxu1 %v2344_v17 }
0x14da   :  { %v1054_v21 = vpop.f32.mrf.mxu1 }
0x14db   :  { %v1060_v22 = vadd.f32 %v1054_v21, %v1012_v20 }
0x14dc   :  { %v2122_v23 = vpop.f32.mrf.mxu1 }
0x14dd   :  { %v1913_v26 = vmul.f32 -1.442695, %v1060_v22 }
0x14de   :  { %v1057_v27 = vpop.f32.mrf.mxu1 }
0x14df   :  { %2242 = vpow2.f32 %v1913_v26 }
0x14e0   :  { %v2123_v28 = vpop.f32.mrf.mxu1 }
0x14e1   :  { %v1190_v28 = vld [vmem:[#allocation2 + $0x24] sm:$0xf] }
0x14ec   :  { %v2243_v29 = vpop.eup %2242 }
0x14ed   :  { %v1064_v31 = vadd.f32 1.0, %v2243_v29 }
0x14ef   :  { %2244 = vrcp.f32 %v1064_v31 }
0x14fc   :  { %v2245_v32 = vpop.eup %2244 }
0x14fd   :  { %v1067_v33 = vmul.f32 2.0, %v2245_v32  ;;  %v1069_v39 = vmul.f32 %v2245_v32, %v1011_v38 }
0x14ff   :  { %v1914_v34 = vadd.f32 -1.0, %v1067_v33 }
0x1501   :  { %1071 = vrot.lane.b32.xlu1 %v1914_v34, %s2346_s6 }
0x1505   :  { %1089 = vperm.xlu1 %2197, %v1087_v35  }
0x1573   :  { %v1072_v36 = vpop.permute.xlu1 %1071 }
0x1574   :  { %v1074_v37 = vmul.f32 %v2245_v32, %v1072_v36 }
0x1576   :  { %1076 = vrot.lane.b32.xlu0 %v1074_v37, %s2347_s19 }
0x1580   :  { %v2709_v47 = vpop.permute.xlu1 %1089 }
0x1581   :  { %vm1091_vm11 = vcmp.eq.s32.totalorder %v2709_v47, 1 }
0x15e8   :  { %v1077_v40 = vpop.permute.xlu0 %1076 }
0x15e9   :  { %v1079_v42 = vadd.f32 %v1077_v40, %v1069_v39 }
0x15eb   :  { %2246 = vtanh.f32 %v1079_v42  ;;  %v1100_v7 = vsel %vm1091_vm11, %v1079_v42, %v1011_v38  ;;  %v1265_v42 = vsel %vm1264_vm1, 1, %v2343_v2  ;;  %vm1531_vm1 = vcmp.gt.s32.totalorder %v2544_v10, 12 }
0x15f8   :  { %v2247_v46 = vpop.eup %2246 }
0x15f9   :  { %1082 = vrot.lane.b32.xlu0 %v2247_v46, %s2346_s6 }
0x166b   :  { %v1083_v48 = vpop.permute.xlu0 %1082 }
0x166c   :  { %v2711_v50 = vmul.f32 %v2245_v32, %v1083_v48 }
0x166e   :  { %v1099_v52 = vsel %vm1091_vm11, %v2711_v50, %v1010_v16 }
0x166f   :  { %v1102_v53 = vpack.c.bf16 %v1099_v52, %v1099_v52 }
0x1671   :  { %1104 = vrot.lane.b32.xlu1 %v1102_v53, %s2347_s19 }
0x16e3   :  { %v1105_v54 = vpop.permute.xlu1 %1104 }
0x16e4   :  { %2129 = vmatmul.mubr.msk.bf16.vlgmr.msra.gmra.mxu0 %vm92_vm0, %v1105_v54 }
0x16e5   :  { %2141 = vmatpush3.bf16.msra.mxu0 %v2459_v25  ;;  %2144 = vmatprep.mubr.msk.bf16.mxu0 %vm2345_vm9, %v2344_v17 }
0x16e6   :  { %2142 = vmatprep.subr.bf16.mxu0 %v2344_v17 }
0x16e9   :  { %2143 = vmatpush3.bf16.msra.mxu0 %v2472_v30 }
0x16ea   :  { %2156 = vmatprep.subr.bf16.mxu0 %v2344_v17 }
0x17a4   :  { %v1143_v56 = vpop.f32.mrf.mxu0 }
0x17a5   :  { %v1149_v57 = vadd.f32 %v1143_v56, %v1101_v55 }
0x17a6   :  { %v2130_v58 = vpop.f32.mrf.mxu0 }
0x17a7   :  { %v1917_v59 = vmul.f32 -1.442695, %v1149_v57 }
0x17a8   :  { %v1146_v60 = vpop.f32.mrf.mxu0 }
0x17a9   :  { %2248 = vpow2.f32 %v1917_v59 }
0x17aa   :  { %v2131_v61 = vpop.f32.mrf.mxu0 }
0x17b6   :  { %v2249_v62 = vpop.eup %2248 }
0x17b7   :  { %v1153_v63 = vadd.f32 1.0, %v2249_v62 }
0x17b9   :  { %2250 = vrcp.f32 %v1153_v63  ;;  %v1279_v63 = vld [vmem:[#allocation2 + $0x28] sm:$0xf] }
0x17c6   :  { %v2251_v0 = vpop.eup %2250 }
0x17c7   :  { %v1156_v1 = vmul.f32 2.0, %v2251_v0  ;;  %v1158_v12 = vmul.f32 %v2251_v0, %v1100_v7 }
0x17c9   :  { %v1918_v3 = vadd.f32 -1.0, %v1156_v1 }
0x17cb   :  { %1160 = vrot.lane.b32.xlu0 %v1918_v3, %s2346_s6 }
0x17cf   :  { %1178 = vperm.xlu0 %2196, %v1176_v4  }
0x183d   :  { %v1161_v5 = vpop.permute.xlu0 %1160 }
0x183e   :  { %v1163_v6 = vmul.f32 %v2251_v0, %v1161_v5 }
0x1840   :  { %1165 = vrot.lane.b32.xlu1 %v1163_v6, %s2347_s19 }
0x184a   :  { %v2732_v20 = vpop.permute.xlu0 %1178 }
0x184b   :  { %vm1180_vm14 = vcmp.eq.s32.totalorder %v2732_v20, 1 }
0x18b2   :  { %v1166_v16 = vpop.permute.xlu1 %1165 }
0x18b3   :  { %v1168_v18 = vadd.f32 %v1166_v16, %v1158_v12 }
0x18b5   :  { %2252 = vtanh.f32 %v1168_v18 }
0x18c2   :  { %v2253_v19 = vpop.eup %2252 }
0x18c3   :  { %1171 = vrot.lane.b32.xlu1 %v2253_v19, %s2346_s6 }
0x1935   :  { %v1172_v21 = vpop.permute.xlu1 %1171 }
0x1936   :  { %v2734_v22 = vmul.f32 %v2251_v0, %v1172_v21 }
0x1938   :  { %v1188_v23 = vsel %vm1180_vm14, %v2734_v22, %v1099_v52  ;;  %v1189_v52 = vsel %vm1180_vm14, %v1168_v18, %v1100_v7 }
0x1939   :  { %v1191_v26 = vpack.c.bf16 %v1188_v23, %v1188_v23 }
0x193b   :  { %1193 = vrot.lane.b32.xlu0 %v1191_v26, %s2347_s19 }
0x19ad   :  { %v1194_v27 = vpop.permute.xlu0 %1193 }
0x19ae   :  { %2137 = vmatmul.mubr.msk.bf16.vlgmr.msra.gmra.mxu1 %vm92_vm0, %v1194_v27 }
0x19af   :  { %2149 = vmatpush3.bf16.msra.mxu1 %v2459_v25  ;;  %2152 = vmatprep.mubr.msk.bf16.mxu1 %vm2345_vm9, %v2344_v17 }
0x19b0   :  { %2150 = vmatprep.subr.bf16.mxu1 %v2344_v17 }
0x19b3   :  { %2151 = vmatpush3.bf16.msra.mxu1 %v2472_v30 }
0x19b4   :  { %2164 = vmatprep.subr.bf16.mxu1 %v2344_v17 }
0x1a6e   :  { %v1232_v29 = vpop.f32.mrf.mxu1 }
0x1a6f   :  { %v1238_v31 = vadd.f32 %v1232_v29, %v1190_v28 }
0x1a70   :  { %v2138_v32 = vpop.f32.mrf.mxu1 }
0x1a71   :  { %v1921_v33 = vmul.f32 -1.442695, %v1238_v31 }
0x1a72   :  { %v1235_v34 = vpop.f32.mrf.mxu1 }
0x1a73   :  { %2254 = vpow2.f32 %v1921_v33 }
0x1a74   :  { %v2139_v35 = vpop.f32.mrf.mxu1 }
0x1a80   :  { %v2255_v36 = vpop.eup %2254 }
0x1a81   :  { %v1242_v37 = vadd.f32 1.0, %v2255_v36 }
0x1a83   :  { %2256 = vrcp.f32 %v1242_v37  ;;  %v2791_v37 = vld [vmem:[%s3052_s4 + $0x8] sm:$0xff]  }
0x1a90   :  { %v2257_v38 = vpop.eup %2256 }
0x1a91   :  { %v1245_v39 = vmul.f32 2.0, %v2257_v38  ;;  %v1247_v53 = vmul.f32 %v2257_v38, %v1189_v52 }
0x1a93   :  { %v1922_v40 = vadd.f32 -1.0, %v1245_v39  ;;  %v1368_v39 = vld [vmem:[#allocation2 + $0x2c] sm:$0xf] }
0x1a95   :  { %1249 = vrot.lane.b32.xlu1 %v1922_v40, %s2346_s6 }
0x1a99   :  { %1267 = vperm.xlu1 %2197, %v1265_v42  }
0x1b07   :  { %v1250_v46 = vpop.permute.xlu1 %1249 }
0x1b08   :  { %v1252_v48 = vmul.f32 %v2257_v38, %v1250_v46 }
0x1b0a   :  { %1254 = vrot.lane.b32.xlu0 %v1252_v48, %s2347_s19 }
0x1b14   :  { %v2755_v57 = vpop.permute.xlu1 %1267 }
0x1b15   :  { %vm1269_vm3 = vcmp.eq.s32.totalorder %v2755_v57, 1 }
0x1b7c   :  { %v1255_v54 = vpop.permute.xlu0 %1254 }
0x1b7d   :  { %v1257_v55 = vadd.f32 %v1255_v54, %v1247_v53 }
0x1b7f   :  { %2258 = vtanh.f32 %v1257_v55 }
0x1b8c   :  { %v2259_v56 = vpop.eup %2258 }
0x1b8d   :  { %1260 = vrot.lane.b32.xlu0 %v2259_v56, %s2346_s6 }
0x1bff   :  { %v1261_v58 = vpop.permute.xlu0 %1260 }
0x1c00   :  { %v2757_v59 = vmul.f32 %v2257_v38, %v1261_v58  ;;  %v2800_v38 = vld [vmem:[%s3052_s4] sm:$0xff]  }
0x1c02   :  { %v1277_v60 = vsel %vm1269_vm3, %v2757_v59, %v1188_v23  ;;  %v1278_v23 = vsel %vm1269_vm3, %v1257_v55, %v1189_v52  ;;  %v1270_v49 = vsel %vm1269_vm3, %v2757_v59, 0.0 }
0x1c03   :  { %v1280_v61 = vpack.c.bf16 %v1277_v60, %v1277_v60 }
0x1c05   :  { %1282 = vrot.lane.b32.xlu1 %v1280_v61, %s2347_s19  ;;  %v1443_v61 = vsel %vm1442_vm10, 1, %v2343_v2 }
0x1c77   :  { %v1283_v62 = vpop.permute.xlu1 %1282 }
0x1c78   :  { %2145 = vmatmul.mubr.msk.bf16.vlgmr.msra.gmra.mxu0 %vm92_vm0, %v1283_v62 }
0x1c79   :  { %2157 = vmatpush3.bf16.msra.mxu0 %v2459_v25  ;;  %2160 = vmatprep.mubr.msk.bf16.mxu0 %vm2345_vm9, %v2344_v17 }
0x1c7a   :  { %2158 = vmatprep.subr.bf16.mxu0 %v2344_v17 }
0x1c7d   :  { %2159 = vmatpush3.bf16.msra.mxu0 %v2472_v30  ;;  %v1354_v30 = vsel %vm1353_vm5, 1, %v2343_v2 }
0x1c7e   :  { %2172 = vmatprep.subr.bf16.mxu0 %v2344_v17 }
0x1d38   :  { %v1321_v0 = vpop.f32.mrf.mxu0 }
0x1d39   :  { %v1327_v1 = vadd.f32 %v1321_v0, %v1279_v63 }
0x1d3a   :  { %v2146_v3 = vpop.f32.mrf.mxu0 }
0x1d3b   :  { %v1925_v4 = vmul.f32 -1.442695, %v1327_v1 }
0x1d3c   :  { %v1324_v5 = vpop.f32.mrf.mxu0 }
0x1d3d   :  { %2260 = vpow2.f32 %v1925_v4 }
0x1d3e   :  { %v2147_v6 = vpop.f32.mrf.mxu0 }
0x1d4a   :  { %v2261_v7 = vpop.eup %2260 }
0x1d4b   :  { %v1331_v12 = vadd.f32 1.0, %v2261_v7 }
0x1d4d   :  { %2262 = vrcp.f32 %v1331_v12 }
0x1d5a   :  { %v2263_v25 = vpop.eup %2262 }
0x1d5b   :  { %v1334_v16 = vmul.f32 2.0, %v2263_v25  ;;  %v1336_v26 = vmul.f32 %v2263_v25, %v1278_v23 }
0x1d5d   :  { %v1926_v18 = vadd.f32 -1.0, %v1334_v16 }
0x1d5f   :  { %1338 = vrot.lane.b32.xlu0 %v1926_v18, %s2346_s6 }
0x1d63   :  { %1356 = vperm.xlu0 %2196, %v1354_v30   ;;  %v1457_v30 = vld [vmem:[#allocation2 + $0x30] sm:$0xf] }
0x1dd1   :  { %v1339_v19 = vpop.permute.xlu0 %1338 }
0x1dd2   :  { %v1341_v21 = vmul.f32 %v2263_v25, %v1339_v19 }
0x1dd4   :  { %1343 = vrot.lane.b32.xlu1 %v1341_v21, %s2347_s19 }
0x1dde   :  { %v2778_v31 = vpop.permute.xlu0 %1356 }
0x1ddf   :  { %vm1358_vm7 = vcmp.eq.s32.totalorder %v2778_v31, 1 }
0x1e46   :  { %v1344_v27 = vpop.permute.xlu1 %1343 }
0x1e47   :  { %v1346_v28 = vadd.f32 %v1344_v27, %v1336_v26 }
0x1e49   :  { %2264 = vtanh.f32 %v1346_v28  ;;  %v1367_v0 = vsel %vm1358_vm7, %v1346_v28, %v1278_v23 }
0x1e56   :  { %v2265_v29 = vpop.eup %2264 }
0x1e57   :  { %1349 = vrot.lane.b32.xlu1 %v2265_v29, %s2346_s6 }
0x1ec9   :  { %v1350_v32 = vpop.permute.xlu1 %1349 }
0x1eca   :  { %v2780_v33 = vmul.f32 %v2263_v25, %v1350_v32 }
0x1ecc   :  { %v1366_v34 = vsel %vm1358_vm7, %v2780_v33, %v1277_v60  ;;  %v1359_v13 = vsel %vm1358_vm7, %v2780_v33, 0.0 }
0x1ecd   :  { %v1369_v35 = vpack.c.bf16 %v1366_v34, %v1366_v34 }
0x1ecf   :  { %1371 = vrot.lane.b32.xlu0 %v1369_v35, %s2347_s19 }
0x1f41   :  { %v1372_v36 = vpop.permute.xlu0 %1371 }
0x1f42   :  { %2153 = vmatmul.mubr.msk.bf16.vlgmr.msra.gmra.mxu1 %vm92_vm0, %v1372_v36 }
0x1f43   :  { %2165 = vmatpush3.bf16.msra.mxu1 %v2791_v37  ;;  %2168 = vmatprep.mubr.msk.bf16.mxu1 %vm2345_vm9, %v2344_v17 }
0x1f44   :  { %2166 = vmatprep.subr.bf16.mxu1 %v2344_v17 }
0x1f47   :  { %2167 = vmatpush3.bf16.msra.mxu1 %v2800_v38 }
0x1f48   :  { %2180 = vmatprep.subr.bf16.mxu1 %v2344_v17 }
0x2002   :  { %v1410_v40 = vpop.f32.mrf.mxu1 }
0x2003   :  { %v1416_v42 = vadd.f32 %v1410_v40, %v1368_v39  ;;  %v1532_v39 = vsel %vm1531_vm1, 1, %v2343_v2 }
0x2004   :  { %v2154_v46 = vpop.f32.mrf.mxu1 }
0x2005   :  { %v1929_v48 = vmul.f32 -1.442695, %v1416_v42 }
0x2006   :  { %v1413_v52 = vpop.f32.mrf.mxu1 }
0x2007   :  { %2266 = vpow2.f32 %v1929_v48 }
0x2008   :  { %v2155_v53 = vpop.f32.mrf.mxu1 }
0x2014   :  { %v2267_v54 = vpop.eup %2266 }
0x2015   :  { %v1420_v55 = vadd.f32 1.0, %v2267_v54 }
0x2017   :  { %2268 = vrcp.f32 %v1420_v55 }
0x2024   :  { %v2269_v56 = vpop.eup %2268 }
0x2025   :  { %v1423_v58 = vmul.f32 2.0, %v2269_v56  ;;  %v1425_v1 = vmul.f32 %v2269_v56, %v1367_v0 }
0x2027   :  { %v1930_v60 = vadd.f32 -1.0, %v1423_v58 }
0x2029   :  { %1427 = vrot.lane.b32.xlu1 %v1930_v60, %s2346_s6 }
0x202d   :  { %1445 = vperm.xlu1 %2197, %v1443_v61  }
0x209b   :  { %v1428_v62 = vpop.permute.xlu1 %1427 }
0x209c   :  { %v1430_v63 = vmul.f32 %v2269_v56, %v1428_v62  ;;  %v1546_v62 = vld [vmem:[#allocation2 + $0x34] sm:$0xf] }
0x209e   :  { %1432 = vrot.lane.b32.xlu0 %v1430_v63, %s2347_s19 }
0x20a8   :  { %v2811_v6 = vpop.permute.xlu1 %1445 }
0x20a9   :  { %vm1447_vm12 = vcmp.eq.s32.totalorder %v2811_v6, 1 }
0x2110   :  { %v1433_v3 = vpop.permute.xlu0 %1432 }
0x2111   :  { %v1435_v4 = vadd.f32 %v1433_v3, %v1425_v1 }
0x2113   :  { %2270 = vtanh.f32 %v1435_v4  ;;  %v1456_v46 = vsel %vm1447_vm12, %v1435_v4, %v1367_v0 }
0x2120   :  { %v2271_v5 = vpop.eup %2270 }
0x2121   :  { %1438 = vrot.lane.b32.xlu0 %v2271_v5, %s2346_s6 }
0x2193   :  { %v1439_v7 = vpop.permute.xlu0 %1438 }
0x2194   :  { %v2813_v12 = vmul.f32 %v2269_v56, %v1439_v7 }
0x2196   :  { %v1455_v25 = vsel %vm1447_vm12, %v2813_v12, %v1366_v34 }
0x2197   :  { %v1458_v16 = vpack.c.bf16 %v1455_v25, %v1455_v25 }
0x2199   :  { %1460 = vrot.lane.b32.xlu1 %v1458_v16, %s2347_s19 }
0x220b   :  { %v1461_v18 = vpop.permute.xlu1 %1460 }
0x220c   :  { %2161 = vmatmul.mubr.msk.bf16.vlgmr.msra.gmra.mxu0 %vm92_vm0, %v1461_v18 }
0x220d   :  { %2173 = vmatpush3.bf16.msra.mxu0 %v2791_v37  ;;  %2176 = vmatprep.mubr.msk.bf16.mxu0 %vm2345_vm9, %v2344_v17 }
0x220e   :  { %2174 = vmatprep.subr.bf16.mxu0 %v2344_v17 }
0x2211   :  { %2175 = vmatpush3.bf16.msra.mxu0 %v2800_v38 }
0x22cc   :  { %v1499_v19 = vpop.f32.mrf.mxu0 }
0x22cd   :  { %v1505_v21 = vadd.f32 %v1499_v19, %v1457_v30 }
0x22ce   :  { %v2162_v23 = vpop.f32.mrf.mxu0 }
0x22cf   :  { %v1933_v26 = vmul.f32 -1.442695, %v1505_v21 }
0x22d0   :  { %v1502_v27 = vpop.f32.mrf.mxu0 }
0x22d1   :  { %2272 = vpow2.f32 %v1933_v26 }
0x22d2   :  { %v2163_v28 = vpop.f32.mrf.mxu0 }
0x22de   :  { %v2273_v29 = vpop.eup %2272 }
0x22df   :  { %v1509_v32 = vadd.f32 1.0, %v2273_v29 }
0x22e1   :  { %2274 = vrcp.f32 %v1509_v32 }
0x22ee   :  { %v2275_v34 = vpop.eup %2274 }
0x22ef   :  { %v1512_v35 = vmul.f32 2.0, %v2275_v34  ;;  %v1514_v48 = vmul.f32 %v2275_v34, %v1456_v46 }
0x22f1   :  { %v1934_v36 = vadd.f32 -1.0, %v1512_v35 }
0x22f3   :  { %1516 = vrot.lane.b32.xlu0 %v1934_v36, %s2346_s6 }
0x22f7   :  { %1534 = vperm.xlu0 %2196, %v1532_v39  }
0x2365   :  { %v1517_v40 = vpop.permute.xlu0 %1516 }
0x2366   :  { %v1519_v42 = vmul.f32 %v2275_v34, %v1517_v40  ;;  %v1635_v40 = vld [vmem:[#allocation2 + $0x38] sm:$0xf] }
0x2368   :  { %1521 = vrot.lane.b32.xlu1 %v1519_v42, %s2347_s19 }
0x2372   :  { %v2833_v10 = vpop.permute.xlu0 %1534 }
0x2373   :  { %vm1536_vm5 = vcmp.eq.s32.totalorder %v2833_v10, 1 }
0x23da   :  { %v1522_v52 = vpop.permute.xlu1 %1521 }
0x23db   :  { %v1524_v53 = vadd.f32 %v1522_v52, %v1514_v48 }
0x23dd   :  { %2276 = vtanh.f32 %v1524_v53  ;;  %v1545_v21 = vsel %vm1536_vm5, %v1524_v53, %v1456_v46 }
0x23ea   :  { %v2277_v54 = vpop.eup %2276 }
0x23eb   :  { %1527 = vrot.lane.b32.xlu1 %v2277_v54, %s2346_s6 }
0x245d   :  { %v1528_v55 = vpop.permute.xlu1 %1527 }
0x245e   :  { %v2835_v56 = vmul.f32 %v2275_v34, %v1528_v55 }
0x2460   :  { %v1544_v58 = vsel %vm1536_vm5, %v2835_v56, %v1455_v25 }
0x2461   :  { %v1547_v60 = vpack.c.bf16 %v1544_v58, %v1544_v58 }
0x2463   :  { %1549 = vrot.lane.b32.xlu0 %v1547_v60, %s2347_s19 }
0x24d5   :  { %v1550_v61 = vpop.permute.xlu0 %1549 }
0x24d6   :  { %2169 = vmatmul.mubr.msk.bf16.vlgmr.msra.gmra.mxu1 %vm92_vm0, %v1550_v61 }
0x24d7   :  { %2181 = vmatpush3.bf16.msra.mxu1 %v2791_v37  ;;  %2184 = vmatprep.mubr.msk.bf16.mxu1 %vm2345_vm9, %v2344_v17 }
0x24d8   :  { %2182 = vmatprep.subr.bf16.mxu1 %v2344_v17  ;;  %v2851_v17 = vld [vmem:[%s3049_s1] sm:$0xf] }
0x24d9   :  { %vm1620_vm9 = vcmp.gt.s32.totalorder %v2851_v17, 13  ;;  %vm1709_vm1 = vcmp.gt.s32.totalorder %v2851_v17, 14 }
0x24db   :  { %2183 = vmatpush3.bf16.msra.mxu1 %v2800_v38  ;;  %v1621_v38 = vsel %vm1620_vm9, 1, %v2343_v2 }
0x2596   :  { %v1588_v63 = vpop.f32.mrf.mxu1 }
0x2597   :  { %v1594_v0 = vadd.f32 %v1588_v63, %v1546_v62  ;;  %v1710_v63 = vsel %vm1709_vm1, 1, %v2343_v2  ;;  %vm1798_vm1 = vcmp.gt.s32.totalorder %v2851_v17, 15 }
0x2598   :  { %v2170_v1 = vpop.f32.mrf.mxu1 }
0x2599   :  { %v1937_v3 = vmul.f32 -1.442695, %v1594_v0 }
0x259a   :  { %v1591_v4 = vpop.f32.mrf.mxu1 }
0x259b   :  { %2278 = vpow2.f32 %v1937_v3 }
0x259c   :  { %v2171_v5 = vpop.f32.mrf.mxu1 }
0x25a8   :  { %v2279_v7 = vpop.eup %2278 }
0x25a9   :  { %v1598_v25 = vadd.f32 1.0, %v2279_v7 }
0x25ab   :  { %2280 = vrcp.f32 %v1598_v25 }
0x25b8   :  { %v2281_v16 = vpop.eup %2280 }
0x25b9   :  { %v1601_v37 = vmul.f32 2.0, %v2281_v16  ;;  %v1603_v23 = vmul.f32 %v2281_v16, %v1545_v21 }
0x25bb   :  { %v1938_v18 = vadd.f32 -1.0, %v1601_v37 }
0x25bd   :  { %1605 = vrot.lane.b32.xlu1 %v1938_v18, %s2346_s6 }
0x25c1   :  { %1623 = vperm.xlu1 %2197, %v1621_v38  }
0x262f   :  { %v1606_v30 = vpop.permute.xlu1 %1605 }
0x2630   :  { %v1608_v19 = vmul.f32 %v2281_v16, %v1606_v30 }
0x2632   :  { %1610 = vrot.lane.b32.xlu0 %v1608_v19, %s2347_s19 }
0x263c   :  { %v2860_v29 = vpop.permute.xlu1 %1623 }
0x263d   :  { %vm1625_vm10 = vcmp.eq.s32.totalorder %v2860_v29, 1 }
0x26a4   :  { %v1611_v26 = vpop.permute.xlu0 %1610 }
0x26a5   :  { %v1613_v27 = vadd.f32 %v1611_v26, %v1603_v23 }
0x26a7   :  { %2282 = vtanh.f32 %v1613_v27  ;;  %v2876_v3 = vsel %vm1625_vm10, %v1613_v27, %v1545_v21  ;;  %v1724_v21 = vld [vmem:[#allocation2 + $0x3c] sm:$0xf] }
0x26b4   :  { %v2283_v28 = vpop.eup %2282 }
0x26b5   :  { %1616 = vrot.lane.b32.xlu0 %v2283_v28, %s2346_s6 }
0x2727   :  { %v1617_v32 = vpop.permute.xlu0 %1616 }
0x2728   :  { %v2862_v34 = vmul.f32 %v2281_v16, %v1617_v32 }
0x272a   :  { %v1633_v35 = vsel %vm1625_vm10, %v2862_v34, %v1544_v58  ;;  %v1626_v43 = vsel %vm1625_vm10, %v2862_v34, 0.0 }
0x272b   :  { %v1636_v36 = vpack.c.bf16 %v1633_v35, %v1633_v35 }
0x272d   :  { %1638 = vrot.lane.b32.xlu1 %v1636_v36, %s2347_s19 }
0x279f   :  { %v1639_v39 = vpop.permute.xlu1 %1638 }
0x27a0   :  { %2177 = vmatmul.mubr.msk.bf16.vlgmr.msra.gmra.mxu0 %vm92_vm0, %v1639_v39 }
0x2860   :  { %v1677_v42 = vpop.f32.mrf.mxu0 }
0x2861   :  { %v1683_v46 = vadd.f32 %v1677_v42, %v1635_v40 }
0x2862   :  { %v2178_v48 = vpop.f32.mrf.mxu0 }
0x2863   :  { %v1941_v52 = vmul.f32 -1.442695, %v1683_v46  ;;  %v1799_v48 = vsel %vm1798_vm1, 1, %v2343_v2  ;;  %v1003_v2 = vsel %vm1002_vm8, %v2688_v14, 0.0 }
0x2864   :  { %v1680_v53 = vpop.f32.mrf.mxu0 }
0x2865   :  { %2284 = vpow2.f32 %v1941_v52  ;;  %v647_v52 = vsel %vm646_vm15, %v2596_v15, 0.0  ;;  %v825_v53 = vsel %vm824_vm4, %v2642_v11, 0.0  ;;  %v1537_v15 = vsel %vm1536_vm5, %v2835_v56, 0.0 }
0x2866   :  { %v2179_v54 = vpop.f32.mrf.mxu0 }
0x2872   :  { %v2285_v55 = vpop.eup %2284 }
0x2873   :  { %v1687_v60 = vadd.f32 1.0, %v2285_v55 }
0x2875   :  { %2286 = vrcp.f32 %v1687_v60 }
0x2882   :  { %v2287_v61 = vpop.eup %2286 }
0x2883   :  { %v1690_v62 = vmul.f32 2.0, %v2287_v61  ;;  %v1692_v4 = vmul.f32 %v2287_v61, %v2876_v3 }
0x2885   :  { %v1942_v58 = vadd.f32 -1.0, %v1690_v62 }
0x2887   :  { %1694 = vrot.lane.b32.xlu0 %v1942_v58, %s2346_s6  ;;  %v558_v58 = vsel %vm557_vm13, %v2572_v51, 0.0  ;;  %v1448_v51 = vsel %vm1447_vm12, %v2813_v12, 0.0 }
0x288b   :  { %1712 = vperm.xlu0 %2196, %v1710_v63   ;;  %v736_v63 = vsel %vm735_vm2, %v2619_v45, 0.0 }
0x28f9   :  { %v1695_v0 = vpop.permute.xlu0 %1694 }
0x28fa   :  { %v1697_v1 = vmul.f32 %v2287_v61, %v1695_v0  ;;  %v914_v0 = vsel %vm913_vm6, %v2665_v44, 0.0 }
0x28fc   :  { %1699 = vrot.lane.b32.xlu1 %v1697_v1, %s2347_s19  ;;  %v1092_v1 = vsel %vm1091_vm11, %v2711_v50, 0.0 }
0x2906   :  { %v2883_v16 = vpop.permute.xlu0 %1712 }
0x2907   :  { %vm1714_vm9 = vcmp.eq.s32.totalorder %v2883_v16, 1 }
0x296e   :  { %v1700_v5 = vpop.permute.xlu1 %1699 }
0x296f   :  { %v2879_v7 = vadd.f32 %v1700_v5, %v1692_v4 }
0x2971   :  { %2288 = vtanh.f32 %v2879_v7  ;;  %v1723_v17 = vsel %vm1714_vm9, %v2879_v7, %v2876_v3 }
0x297e   :  { %v2289_v25 = vpop.eup %2288 }
0x297f   :  { %1705 = vrot.lane.b32.xlu1 %v2289_v25, %s2346_s6 }
0x29f1   :  { %v1706_v37 = vpop.permute.xlu1 %1705 }
0x29f2   :  { %v2885_v18 = vmul.f32 %v2287_v61, %v1706_v37 }
0x29f4   :  { %v2891_v38 = vsel %vm1714_vm9, %v2885_v18, %v1633_v35 }
0x29f5   :  { %v1725_v30 = vpack.c.bf16 %v2891_v38, %v2891_v38 }
0x29f7   :  { %1727 = vrot.lane.b32.xlu0 %v1725_v30, %s2347_s19 }
0x2a69   :  { %v1728_v19 = vpop.permute.xlu0 %1727 }
0x2a6a   :  { %2185 = vmatmul.mubr.msk.bf16.vlgmr.msra.gmra.mxu1 %vm92_vm0, %v1728_v19  ;;  %vm475_vm0 = vcmask 257024  }
0x2b2a   :  { %v1766_v23 = vpop.f32.mrf.mxu1 }
0x2b2b   :  { %v1772_v26 = vadd.f32 %v1766_v23, %v1724_v21 }
0x2b2c   :  { %v2186_v27 = vpop.f32.mrf.mxu1 }
0x2b2d   :  { %v1945_v28 = vmul.f32 -1.442695, %v1772_v26 }
0x2b2e   :  { %v1769_v32 = vpop.f32.mrf.mxu1 }
0x2b2f   :  { %2290 = vpow2.f32 %v1945_v28 }
0x2b30   :  { %v2187_v36 = vpop.f32.mrf.mxu1 }
0x2b3c   :  { %v2291_v39 = vpop.eup %2290 }
0x2b3d   :  { %v1776_v40 = vadd.f32 1.0, %v2291_v39 }
0x2b3f   :  { %2292 = vrcp.f32 %v1776_v40 }
0x2b4c   :  { %v2897_v35 = vpop.eup %2292 }
0x2b4d   :  { %v1779_v42 = vmul.f32 2.0, %v2897_v35  ;;  %v1781_v54 = vmul.f32 %v2897_v35, %v1723_v17 }
0x2b4f   :  { %v1946_v46 = vadd.f32 -1.0, %v1779_v42 }
0x2b51   :  { %1783 = vrot.lane.b32.xlu1 %v1946_v46, %s2346_s6 }
0x2b55   :  { %1801 = vperm.xlu1 %2197, %v1799_v48  }
0x2b59   :  { %472 = vrot.lane.b32.xlu1 %v2552_v24, %s2347_s19  ;;  %v1181_v24 = vsel %vm1180_vm14, %v2734_v22, 0.0 }
0x2b5d   :  { %649 = vrot.lane.b32.xlu1 %v647_v52, %s2347_s19 }
0x2b61   :  { %827 = vrot.lane.b32.xlu1 %v825_v53, %s2347_s19 }
0x2b65   :  { %1005 = vrot.lane.b32.xlu1 %v1003_v2, %s2347_s19 }
0x2b69   :  { %1183 = vrot.lane.b32.xlu1 %v1181_v24, %s2347_s19 }
0x2b6d   :  { %1361 = vrot.lane.b32.xlu1 %v1359_v13, %s2347_s19 }
0x2b71   :  { %1539 = vrot.lane.b32.xlu1 %v1537_v15, %s2347_s19 }
0x2bc3   :  { %v1784_v8 = vpop.permute.xlu1 %1783 }
0x2bc4   :  { %v1786_v11 = vmul.f32 %v2897_v35, %v1784_v8 }
0x2bc6   :  { %1788 = vrot.lane.b32.xlu0 %v1786_v11, %s2347_s19 }
0x2bd0   :  { %v1802_v9 = vpop.permute.xlu1 %1801 }
0x2bd1   :  { %vm1803_vm15 = vcmp.eq.s32.totalorder %v1802_v9, 1 }
0x2bd4   :  { %v473_v14 = vpop.permute.xlu1 %472 }
0x2bd5   :  { %476 = vst.msk [vmem:[%s3055_s7] sm:$0xf] %vm475_vm0, %v473_v14 }
0x2bd8   :  { %v650_v20 = vpop.permute.xlu1 %649 }
0x2bd9   :  { %1895 = vst.msk [vmem:[%s3055_s7 + $0x8] sm:$0xf] %vm475_vm0, %v650_v20 }
0x2bdc   :  { %v828_v22 = vpop.permute.xlu1 %827 }
0x2bdd   :  { %1903 = vst.msk [vmem:[%s3055_s7 + $0x10] sm:$0xf] %vm475_vm0, %v828_v22 }
0x2be0   :  { %v1006_v31 = vpop.permute.xlu1 %1005 }
0x2be1   :  { %1911 = vst.msk [vmem:[%s3055_s7 + $0x18] sm:$0xf] %vm475_vm0, %v1006_v31 }
0x2be4   :  { %v1184_v33 = vpop.permute.xlu1 %1183 }
0x2be5   :  { %1919 = vst.msk [vmem:[%s3055_s7 + $0x20] sm:$0xf] %vm475_vm0, %v1184_v33 }
0x2be8   :  { %v1362_v10 = vpop.permute.xlu1 %1361 }
0x2be9   :  { %1927 = vst.msk [vmem:[%s3055_s7 + $0x28] sm:$0xf] %vm475_vm0, %v1362_v10 }
0x2bec   :  { %v1540_v56 = vpop.permute.xlu1 %1539 }
0x2bed   :  { %1935 = vst.msk [vmem:[%s3055_s7 + $0x30] sm:$0xf] %vm475_vm0, %v1540_v56 }
0x2c38   :  { %v1789_v55 = vpop.permute.xlu0 %1788 }
0x2c39   :  { %v1791_v60 = vadd.f32 %v1789_v55, %v1781_v54 }
0x2c3b   :  { %2294 = vtanh.f32 %v1791_v60  ;;  %v1812_v62 = vsel %vm1803_vm15, %v1791_v60, %v1723_v17 }
0x2c48   :  { %v2295_v61 = vpop.eup %2294 }
0x2c49   :  { %1794 = vrot.lane.b32.xlu0 %v2295_v61, %s2346_s6 }
0x2c4d   :  { %1819 = vrot.lane.b32.xlu0 %v1812_v62, %s2348_s13 }
0x2c51   :  { %560 = vrot.lane.b32.xlu0 %v558_v58, %s2347_s19 }
0x2c55   :  { %738 = vrot.lane.b32.xlu0 %v736_v63, %s2347_s19 }
0x2c59   :  { %916 = vrot.lane.b32.xlu0 %v914_v0, %s2347_s19 }
0x2c5d   :  { %1094 = vrot.lane.b32.xlu0 %v1092_v1, %s2347_s19 }
0x2c61   :  { %1272 = vrot.lane.b32.xlu0 %v1270_v49, %s2347_s19 }
0x2c65   :  { %1450 = vrot.lane.b32.xlu0 %v1448_v51, %s2347_s19 }
0x2c69   :  { %1628 = vrot.lane.b32.xlu0 %v1626_v43, %s2347_s19 }
0x2cbb   :  { %v1795_v45 = vpop.permute.xlu0 %1794 }
0x2cbc   :  { %v1797_v41 = vmul.f32 %v2897_v35, %v1795_v45 }
0x2cbe   :  { %v1804_v44 = vsel %vm1803_vm15, %v1797_v41, 0.0  ;;  %v1811_v47 = vsel %vm1803_vm15, %v1797_v41, %v2891_v38 }
0x2cbf   :  { %v1820_v50 = vpop.permute.xlu0 %1819  ;;  %1814 = vrot.lane.b32.xlu1 %v1811_v47, %s2347_s19  ;;  %1806 = vrot.lane.b32.xlu0 %v1804_v44, %s2347_s19 }
0x2cc0   :  { %1822 = vst.msk [vmem:[#allocation5] sm:$0xf] %vm475_vm0, %v1820_v50 }
0x2cc1   :  { %2310 = shalt.err (!%p2307_p4)
}
0x2cc2   :  { %1846 = dma.vmem_to_hbm [thread:$0]  %s1844_s15, 64, %s3057_s9, [#allocation6]   ;;  %v1715_v57 = vsel %vm1714_vm9, %v2885_v18, 0.0 }
0x2cc3   :  { %v561_v59 = vpop.permute.xlu0 %560  ;;  %1717 = vrot.lane.b32.xlu1 %v1715_v57, %s2347_s19  ;;  %s2350_s26 = smov [#allocation3]  }
0x2cc4   :  { %1891 = vst.msk [vmem:[%s3055_s7 + $0x4] sm:$0xf] %vm475_vm0, %v561_v59  ;;  %s1833_s5 = sshll.u32 %s2350_s26, 4  ;;  %s1834_s5 = int_to_ptr.vmem [resolvable:$true] %s1833_s5 }
0x2cc5   :  { %s2319_s29 = scalar_lea.vmem %s1834_s5, 64  ;;  %p2324_p6 = scmp.lt.s32.totalorder %s1834_s5, %s1834_s5 }
0x2cc6   :  { %p2320_p5 = scmp.ne.s32.totalorder %s1834_s5, %s2319_s29  ;;  %p2325_p7 = scmp.lt.s32.totalorder %s2319_s29, %s2319_s29 }
0x2cc7   :  { %v739_v6 = vpop.permute.xlu0 %738 }
0x2cc8   :  { %1899 = vst.msk [vmem:[%s3055_s7 + $0xc] sm:$0xf] %vm475_vm0, %v739_v6  ;;  %p2326_p8 = por %p2325_p7, %p2324_p6 }
0x2cca   :  { %p2327_p9 = pnand %p2326_p8, %p2320_p5 }
0x2ccb   :  { %v917_v12 = vpop.permute.xlu0 %916 }
0x2ccc   :  { %1907 = vst.msk [vmem:[%s3055_s7 + $0x14] sm:$0xf] %vm475_vm0, %v917_v12 }
0x2ccf   :  { %v1095_v29 = vpop.permute.xlu0 %1094 }
0x2cd0   :  { %1915 = vst.msk [vmem:[%s3055_s7 + $0x1c] sm:$0xf] %vm475_vm0, %v1095_v29 }
0x2cd3   :  { %v1273_v34 = vpop.permute.xlu0 %1272 }
0x2cd4   :  { %1923 = vst.msk [vmem:[%s3055_s7 + $0x24] sm:$0xf] %vm475_vm0, %v1273_v34 }
0x2cd7   :  { %v1451_v3 = vpop.permute.xlu0 %1450 }
0x2cd8   :  { %1931 = vst.msk [vmem:[%s3055_s7 + $0x2c] sm:$0xf] %vm475_vm0, %v1451_v3 }
0x2cdb   :  { %v1629_v4 = vpop.permute.xlu0 %1628 }
0x2cdc   :  { %1939 = vst.msk [vmem:[%s3055_s7 + $0x34] sm:$0xf] %vm475_vm0, %v1629_v4 }
0x2d31   :  { %v1807_v5 = vpop.permute.xlu0 %1806  ;;  %v1815_v7 = vpop.permute.xlu1 %1814 }
0x2d32   :  { %1947 = vst.msk [vmem:[%s3055_s7 + $0x3c] sm:$0xf] %vm475_vm0, %v1807_v5  ;;  %1817 = vst.msk [vmem:[#allocation3] sm:$0xf] %vm475_vm0, %v1815_v7 }
0x2d33   :  { %2330 = shalt.err (!%p2327_p9)
}
0x2d34   :  { %1836 = dma.vmem_to_hbm [thread:$0]  %s1834_s5, 64, %s3056_s8, [#allocation4]  }
0x2d35   :  { %v1718_v25 = vpop.permute.xlu1 %1717 }
0x2d36   :  { %1943 = vst.msk [vmem:[%s3055_s7 + $0x38] sm:$0xf] %vm475_vm0, %v1718_v25 }
0x2d37   :  { %2339 = dma.done.wait [#allocation4], 64  }
0x2d38   :  { %2340 = vsyncadd [#allocation4], 4294967232 }
0x2d39   :  { %2341 = dma.done.wait [#allocation6], 64  }
0x2d3a   :  { %2342 = vsyncadd [#allocation6], 4294967232 }
0x2d3b   :  { %1857 = vsyncpa [#allocation4], 1 }
0x2d3c   :  { %1858 = vsyncpa [#allocation6], 1 }

</bundles_post_ra>
